<compile_context>
chip_gen: v7x
topology: tpu7x:2x2x1
jax: 0.10.0
libtpu: 0.0.40
codegen_flags: <defaults>
</compile_context>

<pallas_src>
import jax
import jax.numpy as jnp
import numpy as np
from jax import lax
from jax.experimental import pallas as pl
from jax.experimental.pallas import tpu as pltpu

LANE = 128
SUBLANE = 8


def _round_up(x, m):
    return (x + m - 1) // m * m


# --------------------------------------------------------------------------- #
# Kernel: one (batch image, H-row tile, Cout tile) grid step                   #
# --------------------------------------------------------------------------- #
def repvgg_kernel(xp_ref, w_ref, b_ref, o_ref):
    # xp_ref : (1, h_pad+2, Wp+2, Cp)  bf16  zero-padded image (resident per n)
    # w_ref  : (9*Cp, Tk)              bf16  folded 3x3 weight, im2col layout
    # b_ref  : (1, Tk)                 f32   folded bias
    # o_ref  : (1, Ht, Wp, Tk)               output row tile
    _, ht, wp, tk = o_ref.shape
    cp = xp_ref.shape[-1]

    row0 = pl.program_id(1) * ht
    if ht % SUBLANE == 0:
        row0 = pl.multiple_of(row0, SUBLANE)

    # im2col: 9 ref-level halo slices concatenated on the lane axis.  One
    # deep-K matmul (K = 9*Cp) -> the MXU accumulates across all 9 taps
    # internally; no f32 accumulator is read-modify-written through VMEM.
    parts = []
    for kh in range(3):
        for kw in range(3):
            parts.append(xp_ref[0, pl.ds(row0 + kh, ht), pl.ds(kw, wp), :])
    patch = jnp.concatenate(parts, axis=-1)                  # (Ht, Wp, 9*Cp)

    y = jnp.einsum('hwc,ck->hwk', patch, w_ref[...],
                   preferred_element_type=jnp.float32)       # (Ht, Wp, Tk) f32
    # single-pass epilogue: bias + ReLU + cast
    o_ref[0] = jnp.maximum(y + b_ref[...], 0.0).astype(o_ref.dtype)


# --------------------------------------------------------------------------- #
# Wrapper / glue                                                               #
# --------------------------------------------------------------------------- #
def fold_branches(p):
    """RepVGG eval-mode reparam: fold 3x3+BN, 1x1+BN and identity-BN into one
    equivalent 3x3 weight / bias pair (exactly equivalent in eval mode)."""
    w_eq = p['w3'] * p['s3'][None, None, None, :]             # (3,3,Cin,Cout)
    center = p['w1'] * p['s1'][None, :]                       # (Cin,Cout)
    if 'sid' in p:                                            # identity branch (Cin==Cout)
        center = center + jnp.diag(p['sid'])
    w_eq = w_eq.at[1, 1].add(center)
    b_eq = p['b3'] + p['b1'] + p.get('bid', jnp.zeros_like(p['b3']))
    return w_eq, b_eq


def _pick_cout_tile(cp, kp, esz, budget=8 << 20):
    """Largest multiple-of-LANE divisor of kp whose double-buffered folded
    weight slab stays under `budget` bytes (keeps wide stages v7x-friendly)."""
    best = LANE
    for tk in range(LANE, kp + 1, LANE):
        if kp % tk == 0 and 2 * 9 * cp * tk * esz <= budget:
            best = tk
    return best


def repvgg_block(x_nchw, params, *, block_h=None,
                 compute_dtype=jnp.bfloat16, out_dtype=jnp.bfloat16):
    """x_nchw: (N, C, H, W) float32 -> (N, Cout, H, W) in out_dtype."""
    N, Cin, H, W = x_nchw.shape
    Cout = params['w3'].shape[-1]
    # TODO(synk): stride=2 / grouped-conv / deploy RepVGG variants are not
    # handled here; this kernel implements the stride-1, groups=1 path with
    # eval-mode BatchNorm folded into the conv.

    # ---- fold branches + BN (f32), pad channels lane-dense, im2col weight
    w_eq, b_eq = fold_branches(params)
    cp = _round_up(Cin, LANE)
    kp = _round_up(Cout, LANE)
    esz = jnp.dtype(compute_dtype).itemsize
    out_esz = jnp.dtype(out_dtype).itemsize

    w_p = jnp.zeros((3, 3, cp, kp), jnp.float32).at[:, :, :Cin, :Cout].set(w_eq)
    w_p = w_p.reshape(9 * cp, kp).astype(compute_dtype)       # matches im2col concat order
    b_p = jnp.zeros((1, kp), jnp.float32).at[:, :Cout].set(b_eq)

    # ---- tiling
    ht = block_h or max(SUBLANE, min(32, H))
    ht = min(ht, H)
    n_h = pl.cdiv(H, ht)
    h_pad = n_h * ht
    wp_ = _round_up(W, SUBLANE)             # sublane-aligned output width
    tk = _pick_cout_tile(cp, kp, esz)
    n_k = kp // tk

    # NCHW -> NHWC, +1 spatial halo (and H/W alignment pad), channel zero-pad.
    # TODO(synk): carry NHWC activations through the surrounding model so these
    # wrapper transposes/pads disappear; kept to preserve the NCHW module API.
    x_nhwc = jnp.transpose(x_nchw, (0, 2, 3, 1))
    x_p = jnp.pad(x_nhwc, ((0, 0), (1, 1 + h_pad - H),
                           (1, 1 + wp_ - W), (0, cp - Cin))).astype(compute_dtype)

    # ---- generation-aware VMEM budget
    try:
        vmem_cap = pltpu.get_tpu_info().vmem_capacity_bytes   # 128 MiB v5e/v6e, 64 MiB v7x
    except Exception:
        vmem_cap = 64 << 20                                    # conservative fallback
    limit_cap = int(vmem_cap * 0.85)

    in_block = (h_pad + 2) * (wp_ + 2) * cp * esz
    w_block = 9 * cp * tk * esz
    b_block = SUBLANE * max(tk, LANE) * 4
    out_block = ht * wp_ * tk * out_esz
    interm = ht * wp_ * 9 * cp * esz + ht * wp_ * tk * 4      # im2col patch + f32 result

    def budget(img_bufs):
        return (img_bufs * in_block + 2 * (w_block + b_block + out_block)
                + interm + (2 << 20))

    img_bufs = 2
    if budget(2) > limit_cap:
        img_bufs = 1                         # single-buffer the resident image (v7x, big images)
    img_kwargs = {} if img_bufs == 2 else dict(pipeline_mode=pl.Buffered(1))
    vmem_limit = int(min(max(budget(img_bufs), 16 << 20), limit_cap))

    out = pl.pallas_call(
        repvgg_kernel,
        out_shape=jax.ShapeDtypeStruct((N, h_pad, wp_, kp), out_dtype),
        grid=(N, n_h, n_k),
        in_specs=[
            # full padded image per batch element; block index independent of
            # the h/k axes so it stays VMEM-resident across row/Cout tiles
            pl.BlockSpec((1, h_pad + 2, wp_ + 2, cp),
                         lambda n, h, k: (n, 0, 0, 0), **img_kwargs),
            pl.BlockSpec((9 * cp, tk), lambda n, h, k: (0, k)),
            pl.BlockSpec((1, tk), lambda n, h, k: (0, k)),
        ],
        out_specs=pl.BlockSpec((1, ht, wp_, tk), lambda n, h, k: (n, h, 0, k)),
        compiler_params=pltpu.CompilerParams(
            # all axes independent (no cross-step accumulation) -> both v7x
            # TensorCores get work even for N=1
            dimension_semantics=("parallel", "parallel", "parallel"),
            vmem_limit_bytes=vmem_limit),
    )(x_p, w_p, b_p)

    out = out[:, :H, :W, :Cout]
    return jnp.transpose(out, (0, 3, 1, 2))   # back to NCHW (out_dtype)


# --------------------------------------------------------------------------- #
# Deterministic parameters + plain-JAX reference                               #
# --------------------------------------------------------------------------- #
def make_params(key, cin, cout, eps=1e-5):
    ks = jax.random.split(key, 14)
    w3 = jax.random.normal(ks[0], (3, 3, cin, cout), jnp.float32) * 0.1
    w1 = jax.random.normal(ks[1], (cin, cout), jnp.float32) * 0.1

    def bn(k0, k1, k2, k3, c):
        gamma = 1.0 + 0.1 * jax.random.normal(k0, (c,), jnp.float32)
        beta = 0.1 * jax.random.normal(k1, (c,), jnp.float32)
        mean = 0.1 * jax.random.normal(k2, (c,), jnp.float32)
        var = jnp.abs(jax.random.normal(k3, (c,), jnp.float32)) + 0.5
        scale = gamma * lax.rsqrt(var + eps)
        return scale, beta - mean * scale

    s3, b3 = bn(ks[2], ks[3], ks[4], ks[5], cout)
    s1, b1 = bn(ks[6], ks[7], ks[8], ks[9], cout)
    sid, bid = bn(ks[10], ks[11], ks[12], ks[13], cin)   # identity BN (cin == cout)
    return dict(w3=w3, w1=w1, s3=s3, b3=b3, s1=s1, b1=b1, sid=sid, bid=bid)


def reference(x_nchw, p):
    """Unfused plain-JAX f32 reference (matches the PyTorch eval-mode forward)."""
    w3 = jnp.transpose(p['w3'], (3, 2, 0, 1))                # (Cout,Cin,3,3)
    w1 = jnp.transpose(p['w1'], (1, 0))[:, :, None, None]    # (Cout,Cin,1,1)
    dn = lax.conv_dimension_numbers(x_nchw.shape, w3.shape, ('NCHW', 'OIHW', 'NCHW'))
    y3 = lax.conv_general_dilated(x_nchw, w3, (1, 1), ((1, 1), (1, 1)),
                                  dimension_numbers=dn,
                                  precision=lax.Precision.HIGHEST)
    y1 = lax.conv_general_dilated(x_nchw, w1, (1, 1), ((0, 0), (0, 0)),
                                  dimension_numbers=dn,
                                  precision=lax.Precision.HIGHEST)
    c = lambda v: v.reshape(1, -1, 1, 1)
    y = (y3 * c(p['s3']) + c(p['b3'])
         + y1 * c(p['s1']) + c(p['b1'])
         + x_nchw * c(p['sid']) + c(p['bid']))
    return jnp.maximum(y, 0.0)


if __name__ == "__main__":
    key = jax.random.PRNGKey(0)
    kx, kparam = jax.random.split(key)

    N, C, H, W = 2, 4, 16, 16            # inp == oup, stride 1, k=3, p=1
    x = jax.random.normal(kx, (N, C, H, W), jnp.float32)
    params = make_params(kparam, C, C)

    out = jax.block_until_ready(repvgg_block(x, params, block_h=8))  # grid (2, 2, 1)
    ref = jax.block_until_ready(reference(x, params))

    # bf16 MXU operands + bf16 output with f32 accumulation -> loose tolerance.
    np.testing.assert_allclose(np.asarray(out.astype(jnp.float32)),
                               np.asarray(ref), rtol=3e-2, atol=3e-2)
    print("KERNEL_OK")
</pallas_src>

<mosaic_0001>
module attributes {stable_mosaic.version = 11 : i64} {
  func.func @repvgg_kernel(%arg0: i32, %arg1: i32, %arg2: i32, %arg3: memref<1x18x18x128xbf16, #tpu.memory_space<vmem>>, %arg4: memref<1152x128xbf16, #tpu.memory_space<vmem>>, %arg5: memref<1x128xf32, #tpu.memory_space<vmem>>, %arg6: memref<1x8x16x128xbf16, #tpu.memory_space<vmem>>) attributes {dimension_semantics = [#tpu.dimension_semantics<parallel>, #tpu.dimension_semantics<parallel>, #tpu.dimension_semantics<parallel>], iteration_bounds = array<i64: 2, 2, 1>, scalar_prefetch = 0 : i64, scratch_operands = 0 : i64, tpu.core_type = #tpu.core_type<tc>, window_params = [{transform_indices = @transform_0, window_bounds = array<i64: 1, 18, 18, 128>}, {transform_indices = @transform_1, window_bounds = array<i64: 1152, 128>}, {transform_indices = @transform_2, window_bounds = array<i64: 1, 128>}, {transform_indices = @transform_3, window_bounds = array<i64: 1, 8, 16, 128>}]} {
    %c8_i32 = arith.constant 8 : i32
    %0 = arith.muli %arg1, %c8_i32 : i32
    %1 = tpu.assume_multiple %0, 8 : i32
    %c0_i32 = arith.constant 0 : i32
    %2 = arith.addi %1, %c0_i32 : i32
    %c0 = arith.constant 0 : index
    %3 = arith.index_cast %2 : i32 to index
    %c0_0 = arith.constant 0 : index
    %c0_1 = arith.constant 0 : index
    %4 = vector.load %arg3[%c0, %3, %c0_0, %c0_1] : memref<1x18x18x128xbf16, #tpu.memory_space<vmem>>, vector<1x8x16x128xbf16>
    %5 = vector.shape_cast %4 : vector<1x8x16x128xbf16> to vector<8x16x128xbf16>
    %c0_i32_2 = arith.constant 0 : i32
    %6 = arith.addi %1, %c0_i32_2 : i32
    %c0_3 = arith.constant 0 : index
    %7 = arith.index_cast %6 : i32 to index
    %c1 = arith.constant 1 : index
    %c0_4 = arith.constant 0 : index
    %8 = vector.load %arg3[%c0_3, %7, %c1, %c0_4] : memref<1x18x18x128xbf16, #tpu.memory_space<vmem>>, vector<1x8x16x128xbf16>
    %9 = vector.shape_cast %8 : vector<1x8x16x128xbf16> to vector<8x16x128xbf16>
    %c0_i32_5 = arith.constant 0 : i32
    %10 = arith.addi %1, %c0_i32_5 : i32
    %c0_6 = arith.constant 0 : index
    %11 = arith.index_cast %10 : i32 to index
    %c2 = arith.constant 2 : index
    %c0_7 = arith.constant 0 : index
    %12 = vector.load %arg3[%c0_6, %11, %c2, %c0_7] : memref<1x18x18x128xbf16, #tpu.memory_space<vmem>>, vector<1x8x16x128xbf16>
    %13 = vector.shape_cast %12 : vector<1x8x16x128xbf16> to vector<8x16x128xbf16>
    %c1_i32 = arith.constant 1 : i32
    %14 = arith.addi %1, %c1_i32 : i32
    %c0_8 = arith.constant 0 : index
    %15 = arith.index_cast %14 : i32 to index
    %c0_9 = arith.constant 0 : index
    %c0_10 = arith.constant 0 : index
    %16 = vector.load %arg3[%c0_8, %15, %c0_9, %c0_10] : memref<1x18x18x128xbf16, #tpu.memory_space<vmem>>, vector<1x8x16x128xbf16>
    %17 = vector.shape_cast %16 : vector<1x8x16x128xbf16> to vector<8x16x128xbf16>
    %c1_i32_11 = arith.constant 1 : i32
    %18 = arith.addi %1, %c1_i32_11 : i32
    %c0_12 = arith.constant 0 : index
    %19 = arith.index_cast %18 : i32 to index
    %c1_13 = arith.constant 1 : index
    %c0_14 = arith.constant 0 : index
    %20 = vector.load %arg3[%c0_12, %19, %c1_13, %c0_14] : memref<1x18x18x128xbf16, #tpu.memory_space<vmem>>, vector<1x8x16x128xbf16>
    %21 = vector.shape_cast %20 : vector<1x8x16x128xbf16> to vector<8x16x128xbf16>
    %c1_i32_15 = arith.constant 1 : i32
    %22 = arith.addi %1, %c1_i32_15 : i32
    %c0_16 = arith.constant 0 : index
    %23 = arith.index_cast %22 : i32 to index
    %c2_17 = arith.constant 2 : index
    %c0_18 = arith.constant 0 : index
    %24 = vector.load %arg3[%c0_16, %23, %c2_17, %c0_18] : memref<1x18x18x128xbf16, #tpu.memory_space<vmem>>, vector<1x8x16x128xbf16>
    %25 = vector.shape_cast %24 : vector<1x8x16x128xbf16> to vector<8x16x128xbf16>
    %c2_i32 = arith.constant 2 : i32
    %26 = arith.addi %1, %c2_i32 : i32
    %c0_19 = arith.constant 0 : index
    %27 = arith.index_cast %26 : i32 to index
    %c0_20 = arith.constant 0 : index
    %c0_21 = arith.constant 0 : index
    %28 = vector.load %arg3[%c0_19, %27, %c0_20, %c0_21] : memref<1x18x18x128xbf16, #tpu.memory_space<vmem>>, vector<1x8x16x128xbf16>
    %29 = vector.shape_cast %28 : vector<1x8x16x128xbf16> to vector<8x16x128xbf16>
    %c2_i32_22 = arith.constant 2 : i32
    %30 = arith.addi %1, %c2_i32_22 : i32
    %c0_23 = arith.constant 0 : index
    %31 = arith.index_cast %30 : i32 to index
    %c1_24 = arith.constant 1 : index
    %c0_25 = arith.constant 0 : index
    %32 = vector.load %arg3[%c0_23, %31, %c1_24, %c0_25] : memref<1x18x18x128xbf16, #tpu.memory_space<vmem>>, vector<1x8x16x128xbf16>
    %33 = vector.shape_cast %32 : vector<1x8x16x128xbf16> to vector<8x16x128xbf16>
    %c2_i32_26 = arith.constant 2 : i32
    %34 = arith.addi %1, %c2_i32_26 : i32
    %c0_27 = arith.constant 0 : index
    %35 = arith.index_cast %34 : i32 to index
    %c2_28 = arith.constant 2 : index
    %c0_29 = arith.constant 0 : index
    %36 = vector.load %arg3[%c0_27, %35, %c2_28, %c0_29] : memref<1x18x18x128xbf16, #tpu.memory_space<vmem>>, vector<1x8x16x128xbf16>
    %37 = vector.shape_cast %36 : vector<1x8x16x128xbf16> to vector<8x16x128xbf16>
    %38 = tpu.concatenate %5, %9, %13, %17, %21, %25, %29, %33, %37 in 2 : vector<8x16x128xbf16>, vector<8x16x128xbf16>, vector<8x16x128xbf16>, vector<8x16x128xbf16>, vector<8x16x128xbf16>, vector<8x16x128xbf16>, vector<8x16x128xbf16>, vector<8x16x128xbf16>, vector<8x16x128xbf16> -> vector<8x16x1152xbf16>
    %c0_30 = arith.constant 0 : index
    %c0_31 = arith.constant 0 : index
    %39 = vector.load %arg4[%c0_30, %c0_31] : memref<1152x128xbf16, #tpu.memory_space<vmem>>, vector<1152x128xbf16>
    "tpu.trace_start"() <{level = 10 : i32, message = "hwc,ck->hwk"}> : () -> ()
    %cst = arith.constant dense<0.000000e+00> : vector<8x16x128xf32>
    %40 = tpu.matmul %38, %39, %cst {dimension_numbers = #tpu.dot_dimension_numbers<[2], [0], [0, 1], [1], [0, 0, 0, 1, 1, 1], [], []>} : vector<8x16x1152xbf16>, vector<1152x128xbf16>, vector<8x16x128xf32> -> vector<8x16x128xf32>
    "tpu.trace_stop"() : () -> ()
    %c0_32 = arith.constant 0 : index
    %c0_33 = arith.constant 0 : index
    %41 = vector.load %arg5[%c0_32, %c0_33] : memref<1x128xf32, #tpu.memory_space<vmem>>, vector<1x128xf32>
    %42 = vector.shape_cast %41 : vector<1x128xf32> to vector<1x1x128xf32>
    %43 = vector.broadcast %42 : vector<1x1x128xf32> to vector<8x16x128xf32>
    %44 = arith.addf %40, %43 : vector<8x16x128xf32>
    %cst_34 = arith.constant 0.000000e+00 : f32
    %45 = vector.broadcast %cst_34 : f32 to vector<8x16x128xf32>
    %46 = arith.maximumf %44, %45 : vector<8x16x128xf32>
    %47 = arith.truncf %46 : vector<8x16x128xf32> to vector<8x16x128xbf16>
    %c0_35 = arith.constant 0 : index
    %c0_36 = arith.constant 0 : index
    %c0_37 = arith.constant 0 : index
    %c0_38 = arith.constant 0 : index
    %48 = vector.load %arg6[%c0_35, %c0_36, %c0_37, %c0_38] : memref<1x8x16x128xbf16, #tpu.memory_space<vmem>>, vector<1x8x16x128xbf16>
    %49 = vector.shape_cast %48 : vector<1x8x16x128xbf16> to vector<8x16x128xbf16>
    %50 = vector.shape_cast %47 : vector<8x16x128xbf16> to vector<1x8x16x128xbf16>
    tpu.vector_store %arg6[%c0_35, %c0_36, %c0_37, %c0_38], %50 {strides = array<i32>} : memref<1x8x16x128xbf16, #tpu.memory_space<vmem>>, vector<1x8x16x128xbf16>,
    return
  }
  func.func @transform_0(%arg0: i32, %arg1: i32, %arg2: i32) -> (i32, i32, i32, i32) {
    %c0_i32 = arith.constant 0 : i32
    %c0_i32_0 = arith.constant 0 : i32
    %c0_i32_1 = arith.constant 0 : i32
    %c0_i32_2 = arith.constant 0 : i32
    return %arg0, %c0_i32, %c0_i32_0, %c0_i32_1 : i32, i32, i32, i32
  }
  func.func @transform_1(%arg0: i32, %arg1: i32, %arg2: i32) -> (i32, i32) {
    %c0_i32 = arith.constant 0 : i32
    %c0_i32_0 = arith.constant 0 : i32
    return %c0_i32, %arg2 : i32, i32
  }
  func.func @transform_2(%arg0: i32, %arg1: i32, %arg2: i32) -> (i32, i32) {
    %c0_i32 = arith.constant 0 : i32
    %c0_i32_0 = arith.constant 0 : i32
    return %c0_i32, %arg2 : i32, i32
  }
  func.func @transform_3(%arg0: i32, %arg1: i32, %arg2: i32) -> (i32, i32, i32, i32) {
    %c0_i32 = arith.constant 0 : i32
    %c0_i32_0 = arith.constant 0 : i32
    return %arg0, %arg1, %c0_i32, %arg2 : i32, i32, i32, i32
  }
}

</mosaic_0001>

<bundles_post_ra>
// kernel: tpu_custom_call.1
= control target key start
LH: loop header
LB: loop body
LE: loop exit
PB: predicated region body
PF: predicated region fallthrough
CT: control target
= control target key end

     0   :  { %8 = vsyncpa [#allocation3], 0  ;;  %s4089_s0 = inlined_call_operand.vmem [shape: bf16[2,18,18,128], index: 0, kind: input, shape index: {}]   ;;  %s4090_s1 = inlined_call_operand.vmem [shape: bf16[1152,128], index: 1, kind: input, shape index: {}]   ;;  %s4091_s2 = inlined_call_operand.vmem [shape: f32[1,128], index: 2, kind: input, shape index: {}]   ;;  %s4092_s3 = inlined_call_operand.hbm [shape: bf16[2,16,16,128], index: 3, kind: output, shape index: {}]  }
   0x1   :  { %10 = vsyncpa [#allocation3 + $0x1], 0  ;;  %s3300_s12 = smov 0   ;;  %s3302_s13 = smov 0  }
   0x2   :  { %s3304_s14 = smov 0   ;;  %s3306_s15 = smov 0  }
   0x3   :  { %s3308_s16 = smov 0   ;;  %s3310_s17 = smov 0  }
   0x4   :  { %s3312_s18 = smov 0   ;;  %s3314_s19 = smov 0  }
   0x5 LB: > { %s2330_s20 = sadd.s32 4294967295, %s3275_s19   ;;  %s2331_s21 = sadd.s32 4294967294, %s3275_s19   ;;  %s3275_s19 = sphi %s3314_s19, %s16_s19   ;;  %s3271_s18 = sphi %s3312_s18, %s4101_s18   ;;  %s3267_s17 = sphi %s3310_s17, %s4100_s17   ;;  %s3263_s16 = sphi %s3308_s16, %s4099_s16   ;;  %s3259_s15 = sphi %s3306_s15, %s4098_s15   ;;  %s3255_s14 = sphi %s3304_s14, %s4097_s14   ;;  %s3251_s13 = sphi %s3302_s13, %s4096_s13   ;;  %s3247_s12 = sphi %s3300_s12, %s4095_s12  }
   0x6   : > { %s31_s22 = sadd.s32 1, %s3267_s17  ;;  %s35_s23 = sadd.s32 1, %s3271_s18 }
   0x7   : > { %p33_p0 = scmp.ge.s32.totalorder %s31_s22, 2  ;;  %p134_p1 = scmp.ne.s32.totalorder %s3255_s14, %s3251_s13 }
   0x8   : > { %p135_p2 = scmp.eq.s32.totalorder %s2330_s20, 3  ;;  %p140_p5 = scmp.ne.s32.totalorder %s3251_s13, %s3247_s12 }
   0x9   : > { %s4103_s22 = smov (%p33_p0, %s31_s22), 0  ;;  %s4105_s23 = smov (!%p33_p0, %s35_s23), %s3271_s18 }
   0xa   : > { %s118_s24 = ssub.s32 %s3267_s17, %s4103_s22  ;;  %p3351_p3 = por %p135_p2, %p134_p1 }
   0xb   : > { %p37_p4 = scmp.ge.s32.totalorder %s4105_s23, 2  ;;  %p141_p6 = scmp.eq.s32.totalorder %s2331_s21, 3 }
   0xc   : > { %p2336_p7 = scmp.ge.s32.totalorder %s3275_s19, 1  ;;  %p180_p9 = scmp.lt.s32.totalorder %s3275_s19, 5 }
   0xd   : > { %s4107_s23 = smov (%p37_p4, %s4105_s23), 0  ;;  %p3360_p8 = por %p141_p6, %p140_p5 }
   0xe   : > { %s117_s27 = ssub.s32 %s3271_s18, %s4107_s23  ;;  %s124_s28 = sadd.s32 1, %s3255_s14 }
   0xf   : > { %s119_s29 = sor.u32 %s118_s24, %s117_s27  ;;  %p181_p10 = pnand %p2336_p7, %p180_p9 }
  0x10   : > { %p122_p11 = scmp.eq.s32.totalorder %s119_s29, 0  ;;  %v3037_v0 = vld [vmem:[%s4090_s1 + $0x40] sm:$0xff] (!%p181_p10)   ;;  %v3041_v4 = vld [vmem:[%s4090_s1 + $0x48] sm:$0xff] (!%p181_p10)   ;;  %v3045_v8 = vld [vmem:[%s4090_s1 + $0x50] sm:$0xff] (!%p181_p10)   ;;  %p211_p12 = scmp.lt.s32.totalorder (!%p181_p10), %s3263_s16, 1  ;;  %vm534_vm0 = vcmask (!%p181_p10), 1046528  }
  0x11   : > { %184 = sbr.rel (%p181_p10) target bundleno = 424 (0x1a8), region = 32  ;;  %v3038_v1 = vld [vmem:[%s4090_s1 + $0xc0] sm:$0xff] (!%p181_p10)   ;;  %2643 = vmatprep.subr.bf16.mxu0 (!%p181_p10), %v3037_v0  ;;  %v3042_v5 = vld [vmem:[%s4090_s1 + $0xc8] sm:$0xff] (!%p181_p10)   ;;  %v3046_v9 = vld [vmem:[%s4090_s1 + $0xd0] sm:$0xff] (!%p181_p10)   ;;  %vm405_vm1 = vsmask.f32 (!%p181_p10), 7424 }
  0x12   : > { %s3369_s30 = scalar_select %p122_p11, %s3255_s14, %s124_s28  }
  0x13   : > { %v3039_v2 = vld [vmem:[%s4090_s1] sm:$0xff] (!%p181_p10)   ;;  %2707 = vmatprep.subr.bf16.mxu1 (!%p181_p10), %v3038_v1  ;;  %v3043_v6 = vld [vmem:[%s4090_s1 + $0x8] sm:$0xff] (!%p181_p10)   ;;  %v3047_v10 = vld [vmem:[%s4090_s1 + $0x10] sm:$0xff] (!%p181_p10)   ;;  %s2578_s29 = smul.u32 (!%p181_p10), 96, %s3259_s15  ;;  %s208_s8 = sand.u32 (!%p181_p10), 1, %s3251_s13  }
  0x14   : > { %v3040_v3 = vld [vmem:[%s4090_s1 + $0x80] sm:$0xff] (!%p181_p10)   ;;  %2644 = vmatpush3.bf16.msra.mxu0 (!%p181_p10), %v3039_v2  ;;  %v3044_v7 = vld [vmem:[%s4090_s1 + $0x88] sm:$0xff] (!%p181_p10)   ;;  %v3048_v11 = vld [vmem:[%s4090_s1 + $0x90] sm:$0xff] (!%p181_p10)   ;;  %s2337_s10 = sshll.u32 (!%p181_p10), %s208_s8, 6  ;;  %s2595_s11 = sshll.u32 (!%p181_p10), %s3259_s15, 4 }
  0x15   : > { %2708 = vmatpush3.bf16.msra.mxu1 (!%p181_p10), %v3040_v3  ;;  %2645 = vmatprep.subr.bf16.mxu0 (!%p181_p10), %v3041_v4  ;;  %v3049_v12 = vld [vmem:[%s4090_s1 + $0x58] sm:$0xff] (!%p181_p10)   ;;  %v3053_v16 = vld [vmem:[%s4090_s1 + $0x60] sm:$0xff] (!%p181_p10)   ;;  %v3057_v20 = vld [vmem:[%s4090_s1 + $0x68] sm:$0xff] (!%p181_p10)   ;;  %s2574_s20 = sshll.u32 (!%p181_p10), %s3263_s16, 5  ;;  %s4013_s21 = scalar_lea.vmem (!%p181_p10), [#allocation2], %s2337_s10 }
  0x16   : > { %2709 = vmatprep.subr.bf16.mxu1 (!%p181_p10), %v3042_v5  ;;  %v3050_v13 = vld [vmem:[%s4090_s1 + $0xd8] sm:$0xff] (!%p181_p10)   ;;  %v3054_v17 = vld [vmem:[%s4090_s1 + $0xe0] sm:$0xff] (!%p181_p10)   ;;  %v3058_v21 = vld [vmem:[%s4090_s1 + $0xe8] sm:$0xff] (!%p181_p10)   ;;  %s2210_s15 = sadd.s32 (!%p181_p10), %s2595_s11, %s2574_s20  ;;  %s2213_s27 = sshll.u32 (!%p181_p10), %s4013_s21, 4  ;;  %s4030_s27 = int_to_ptr.vmem [resolvable:$true] %s2213_s27 }
  0x17   : > { %v3051_v14 = vld [vmem:[%s4090_s1 + $0x18] sm:$0xff] (!%p181_p10)   ;;  %v3055_v18 = vld [vmem:[%s4090_s1 + $0x20] sm:$0xff] (!%p181_p10)   ;;  %v3059_v22 = vld [vmem:[%s4090_s1 + $0x28] sm:$0xff] (!%p181_p10)   ;;  %s3277_s6 = smov (!%p181_p10), [#allocation2]  }
  0x18   : > { %2646 = vmatpush3.bf16.msra.mxu0 %v3043_v6  ;;  %v3052_v15 = vld [vmem:[%s4090_s1 + $0x98] sm:$0xff]   ;;  %s212_s24 = scalar_select %p211_p12, %s3263_s16, 1  ;;  %v3056_v19 = vld [vmem:[%s4090_s1 + $0xa0] sm:$0xff]   ;;  %v3060_v23 = vld [vmem:[%s4090_s1 + $0xa8] sm:$0xff]  }
  0x19   : > { %2710 = vmatpush3.bf16.msra.mxu1 %v3044_v7  ;;  %2647 = vmatprep.subr.bf16.mxu0 %v3045_v8  ;;  %v3061_v24 = vld [vmem:[%s4090_s1 + $0x70] sm:$0xff]   ;;  %v3065_v28 = vld [vmem:[%s4090_s1 + $0x78] sm:$0xff]   ;;  %v3074_v36 = vld [vmem:[%s4090_s1 + $0x140] sm:$0xff]   ;;  %s2575_s16 = sshll.u32 %s2210_s15, 6 }
  0x1a   : > { %2711 = vmatprep.subr.bf16.mxu1 %v3046_v9  ;;  %s2963_s9 = smul.u32 216, %s212_s24  ;;  %v3062_v25 = vld [vmem:[%s4090_s1 + $0xf0] sm:$0xff]   ;;  %v3066_v29 = vld [vmem:[%s4090_s1 + $0xf8] sm:$0xff]   ;;  %v3075_v44 = vld [vmem:[%s4090_s1 + $0x1c0] sm:$0xff]   ;;  %s4028_s5 = scalar_lea.hbm %s4092_s3, %s2575_s16 }
  0x1b   : > { %v3063_v26 = vld [vmem:[%s4090_s1 + $0x30] sm:$0xff]   ;;  %v3067_v30 = vld [vmem:[%s4090_s1 + $0x38] sm:$0xff]   ;;  %v3076_v50 = vld [vmem:[%s4090_s1 + $0x100] sm:$0xff]   ;;  %s4037_s24 = scalar_lea.sflag [#allocation3], %s208_s8 }
  0x1c   : > { %2648 = vmatpush3.bf16.msra.mxu0 %v3047_v10  ;;  %s215_s7 = scalar_lea.vmem %s4089_s0, %s2963_s9  ;;  %v3064_v27 = vld [vmem:[%s4090_s1 + $0xb0] sm:$0xff]   ;;  %v3068_v31 = vld [vmem:[%s4090_s1 + $0xb8] sm:$0xff]   ;;  %v3077_v51 = vld [vmem:[%s4090_s1 + $0x180] sm:$0xff]  }
  0x1d   : > { %2712 = vmatpush3.bf16.msra.mxu1 %v3048_v11  ;;  %2649 = vmatprep.subr.bf16.mxu0 %v3049_v12  ;;  %s3467_s28 = scalar_lea.vmem %s215_s7, %s2578_s29  ;;  %v3083_v53 = vld [vmem:[%s4090_s1 + $0x148] sm:$0xff]   ;;  %v3092_v10 = vld [vmem:[%s4090_s1 + $0x150] sm:$0xff]   ;;  %s3181_s29 = scalar_lea.vmem %s4030_s27, 1024 }
  0x1e   : > { %2713 = vmatprep.subr.bf16.mxu1 %v3050_v13  ;;  %v229_v32 = vld [vmem:[%s3467_s28] sm:$0xf]  ;;  %v230_v33 = vld [vmem:[%s3467_s28 + $0x4] sm:$0xf]  ;;  %v2344_v37 = vld [vmem:[%s3467_s28 + $0xc] sm:$0xf]  ;;  %p3182_p13 = scmp.ne.s32.totalorder %s4030_s27, %s3181_s29 }
  0x1f   : > { %v2410_v34 = vcombine.low %v229_v32, %v230_v33  ;;  %v3070_v35 = vld [vmem:[%s3467_s28 + $0x8] ss:$0 sps:$4 sm:$0x11]   ;;  %v3483_v38 = vld [vmem:[%s3467_s28 + $0x10] sm:$0xf] }
  0x20   : > { %2650 = vmatpush3.bf16.msra.mxu0 %v3051_v14  ;;  %v414_v41 = vshll.u32 %v3070_v35, 16  ;;  %v3486_v42 = vcombine.low %v2344_v37, %v3483_v38  ;;  %v253_v43 = vld [vmem:[%s3467_s28] sm:$0xe]  ;;  %v536_v46 = vrot.slane %v3070_v35, 1  ;;  %v231_v55 = vld [vmem:[%s3467_s28 + $0xc] sm:$0xf]  ;;  %p3183_p0 = pnand %p3182_p13, %p3351_p3 }
  0x21   : > { %2714 = vmatpush3.bf16.msra.mxu1 %v3052_v15  ;;  %2651 = vmatprep.subr.bf16.mxu0 %v3053_v16  ;;  %v407_v39 = vshrl.u32 %v2410_v34, 16  ;;  %v409_v40 = vshll.u32 %v2410_v34, 16  ;;  %v2426_v45 = vcombine.low %v253_v43, %v230_v33  ;;  %v232_v56 = vld [vmem:[%s3467_s28 + $0x10] sm:$0xf]  ;;  %v3084_v60 = vld [vmem:[%s4090_s1 + $0x1c8] sm:$0xff]  }
  0x22   : > { %2715 = vmatprep.subr.bf16.mxu1 %v3054_v17  ;;  %v416_v48 = vrot.slane %v414_v41, 1  ;;  %1743 = vmatprep.mubr.bf16.mxu1 %v3486_v42  ;;  %v2411_v58 = vcombine.low %v231_v55, %v232_v56  ;;  %v3079_v59 = vld [vmem:[%s3467_s28 + $0x14] ss:$0 sps:$4 sm:$0x11]   ;;  %v2346_v61 = vld [vmem:[%s3467_s28 + $0x18] sm:$0xf]  ;;  %p3184_p1 = pneg %p3183_p0 }
  0x23   : > { %v411_v47 = vrot.slane %v409_v40, 1  ;;  %v535_v49 = vrot.slane %v2426_v45, 1  ;;  %v3512_v62 = vld [vmem:[%s3467_s28 + $0x1c] sm:$0xf]  ;;  %v426_v1 = vshll.u32 %v3079_v59, 16  ;;  %v3085_v4 = vld [vmem:[%s4090_s1 + $0x108] sm:$0xff]  }
  0x24   : > { %2652 = vmatpush3.bf16.msra.mxu0 %v3055_v18  ;;  %v419_v63 = vshrl.u32 %v2411_v58, 16  ;;  %v421_v0 = vshll.u32 %v2411_v58, 16  ;;  %v3515_v2 = vcombine.low %v2346_v61, %v3512_v62  ;;  %v254_v3 = vld [vmem:[%s3467_s28 + $0xc] sm:$0xe]  ;;  %v539_v6 = vrot.slane %v3079_v59, 1  ;;  %v3093_v12 = vld [vmem:[%s4090_s1 + $0x1d0] sm:$0xff]  }
  0x25   : > { %2716 = vmatpush3.bf16.msra.mxu1 %v3056_v19  ;;  %2653 = vmatprep.subr.bf16.mxu0 %v3057_v20  ;;  %v412_v52 = vor.u32 %v411_v47, %v407_v39  ;;  %v537_v54 = vsel %vm534_vm0, %v535_v49, %v536_v46  ;;  %v2427_v5 = vcombine.low %v254_v3, %v232_v56  ;;  %v3086_v7 = vld [vmem:[%s4090_s1 + $0x188] sm:$0xff]   ;;  %v428_v9 = vrot.slane %v426_v1, 1  ;;  %v233_v15 = vld [vmem:[%s3467_s28 + $0x18] sm:$0xf]  ;;  %v234_v16 = vld [vmem:[%s3467_s28 + $0x1c] sm:$0xf] }
  0x26   : > { %2717 = vmatprep.subr.bf16.mxu1 %v3058_v21  ;;  %v423_v8 = vrot.slane %v421_v0, 1  ;;  %v2412_v18 = vcombine.low %v233_v15, %v234_v16  ;;  %v3088_v19 = vld [vmem:[%s3467_s28 + $0x20] ss:$0 sps:$4 sm:$0x11]   ;;  %v2348_v20 = vld [vmem:[%s3467_s28 + $0x24] sm:$0xf] }
  0x27   : > { %v417_v57 = vsel %vm405_vm1, %v412_v52, %v416_v48  ;;  %v538_v11 = vrot.slane %v2427_v5, 1  ;;  %v3094_v21 = vld [vmem:[%s4090_s1 + $0x110] sm:$0xff]   ;;  %v235_v39 = vld [vmem:[%s3467_s28 + $0x24] sm:$0xf]  ;;  %v236_v41 = vld [vmem:[%s3467_s28 + $0x28] sm:$0xf] }
  0x28   : > { %2654 = vmatpush3.bf16.msra.mxu0 %v3059_v22  ;;  %1646 = vmatprep.mubr.bf16.mxu0 %v417_v57  ;;  %v424_v13 = vor.u32 %v423_v8, %v419_v63  ;;  %v3541_v22 = vld [vmem:[%s3467_s28 + $0x28] sm:$0xf]  ;;  %v2350_v43 = vld [vmem:[%s3467_s28 + $0x30] sm:$0xf]  ;;  %v2413_v45 = vcombine.low %v235_v39, %v236_v41  ;;  %v3567_v47 = vld [vmem:[%s3467_s28 + $0x34] sm:$0xf] }
  0x29   : > { %2718 = vmatpush3.bf16.msra.mxu1 %v3060_v23  ;;  %2655 = vmatprep.subr.bf16.mxu0 %v3061_v24  ;;  %v540_v14 = vsel %vm534_vm0, %v538_v11, %v539_v6  ;;  %v255_v23 = vld [vmem:[%s3467_s28 + $0x18] sm:$0xe]  ;;  %v431_v24 = vshrl.u32 %v2412_v18, 16  ;;  %v3097_v46 = vld [vmem:[%s3467_s28 + $0x2c] ss:$0 sps:$4 sm:$0x11]   ;;  %v3573_v49 = vcombine.low %v2350_v43, %v3567_v47 }
  0x2a   : > { %2719 = vmatprep.subr.bf16.mxu1 %v3062_v25  ;;  %v429_v17 = vsel %vm405_vm1, %v424_v13, %v428_v9  ;;  %v433_v25 = vshll.u32 %v2412_v18, 16  ;;  %v3104_v48 = vld [vmem:[%s4090_s1 + $0x198] sm:$0xff]   ;;  %v445_v52 = vshll.u32 %v2413_v45, 16  ;;  %v545_v56 = vrot.slane %v3097_v46, 1  ;;  %v237_v63 = vld [vmem:[%s3467_s28 + $0x30] sm:$0xf] }
  0x2b   : > { %v238_v0 = vld [vmem:[%s3467_s28 + $0x34] sm:$0xf]  ;;  %v2352_v5 = vld [vmem:[%s3467_s28 + $0x3c] sm:$0xf]  ;;  %v3112_v6 = vld [vmem:[%s4090_s1 + $0x120] sm:$0xff]  }
  0x2c   : > { %2656 = vmatpush3.bf16.msra.mxu0 %v3063_v26  ;;  %v438_v26 = vshll.u32 %v3088_v19, 16  ;;  %v435_v32 = vrot.slane %v433_v25, 1  ;;  %v447_v57 = vrot.slane %v445_v52, 1  ;;  %v2414_v3 = vcombine.low %v237_v63, %v238_v0  ;;  %v3593_v8 = vld [vmem:[%s3467_s28 + $0x40] sm:$0xf] }
  0x2d   : > { %2720 = vmatpush3.bf16.msra.mxu1 %v3064_v27  ;;  %2657 = vmatprep.subr.bf16.mxu0 %v3065_v28  ;;  %v3545_v27 = vcombine.low %v2348_v20, %v3541_v22  ;;  %v3095_v28 = vld [vmem:[%s4090_s1 + $0x190] sm:$0xff]   ;;  %v3597_v13 = vcombine.low %v2352_v5, %v3593_v8  ;;  %v3120_v20 = vld [vmem:[%s4090_s1 + $0x1e8] sm:$0xff]   ;;  %v239_v25 = vld [vmem:[%s3467_s28 + $0x3c] sm:$0xf] }
  0x2e   : > { %2721 = vmatprep.subr.bf16.mxu1 %v3066_v29  ;;  %v2428_v29 = vcombine.low %v255_v23, %v234_v16  ;;  %v440_v33 = vrot.slane %v438_v26, 1  ;;  %v436_v37 = vor.u32 %v435_v32, %v431_v24  ;;  %v257_v9 = vld [vmem:[%s3467_s28 + $0x30] sm:$0xe]  ;;  %v457_v11 = vshll.u32 %v2414_v3, 16  ;;  %v3121_v23 = vld [vmem:[%s4090_s1 + $0x128] sm:$0xff]  }
  0x2f   : > { %v2430_v15 = vcombine.low %v257_v9, %v238_v0  ;;  %v3115_v32 = vld [vmem:[%s3467_s28 + $0x44] ss:$0 sps:$4 sm:$0x11]   ;;  %v241_v52 = vld [vmem:[%s3467_s28 + $0x48] sm:$0xf] }
  0x30   : > { %2658 = vmatpush3.bf16.msra.mxu0 %v3067_v30  ;;  %v542_v30 = vrot.slane %v3088_v19, 1  ;;  %v541_v35 = vrot.slane %v2428_v29, 1  ;;  %v2354_v29 = vld [vmem:[%s3467_s28 + $0x48] sm:$0xf] }
  0x31   : > { %2722 = vmatpush3.bf16.msra.mxu1 %v3068_v31  ;;  %2771 = vmatprep.subr.bf16.mxu0 %v3074_v36  ;;  %v3101_v31 = vld [vmem:[%s4090_s1 + $0x158] sm:$0xff]  }
  0x32   : > { %2835 = vmatprep.subr.bf16.mxu1 %v3075_v44  ;;  %v3103_v36 = vld [vmem:[%s4090_s1 + $0x118] sm:$0xff]   ;;  %v543_v40 = vsel %vm534_vm0, %v541_v35, %v542_v30  ;;  %v441_v44 = vsel %vm405_vm1, %v436_v37, %v440_v33  ;;  %v3619_v33 = vld [vmem:[%s3467_s28 + $0x4c] sm:$0xf] }
  0x33   : > { %1647 = vmatmul.mubr.bf16.vlgmr.msra.gmra.mrb[0].mxu0 %v2410_v34  ;;  %v3102_v34 = vld [vmem:[%s4090_s1 + $0x1d8] sm:$0xff]   ;;  %v3625_v35 = vcombine.low %v2354_v29, %v3619_v33 }
  0x34   : > { %1744 = vmatmul.mubr.bf16.vlgmr.msra.gmra.mrb[0].mxu1 %v537_v54  ;;  %2772 = vmatpush3.bf16.msra.mxu0 %v3076_v50  ;;  %v256_v50 = vld [vmem:[%s3467_s28 + $0x24] sm:$0xe] }
  0x35   : > { %2836 = vmatpush3.bf16.msra.mxu1 %v3077_v51  ;;  %1751 = vmatprep.mubr.bf16.mxu1 %v3515_v2  ;;  %v443_v51 = vshrl.u32 %v2413_v45, 16  ;;  %v3110_v54 = vld [vmem:[%s4090_s1 + $0x160] sm:$0xff]   ;;  %v2429_v55 = vcombine.low %v256_v50, %v236_v41  ;;  %v3128_v41 = vld [vmem:[%s4090_s1 + $0x170] sm:$0xff]  }
  0x36   : > { %2837 = vmatprep.subr.bf16.mxu1 %v3084_v60  ;;  %2773 = vmatprep.subr.bf16.mxu0 %v3083_v53  ;;  %v450_v53 = vshll.u32 %v3097_v46, 16  ;;  %v3111_v60 = vld [vmem:[%s4090_s1 + $0x1e0] sm:$0xff]   ;;  %v3129_v50 = vld [vmem:[%s4090_s1 + $0x1f0] sm:$0xff]  }
  0x37   : > { %1654 = vmatprep.mubr.bf16.mxu0 %v429_v17  ;;  %v544_v59 = vrot.slane %v2429_v55, 1  ;;  %v448_v61 = vor.u32 %v447_v57, %v443_v51  ;;  %v3119_v17 = vld [vmem:[%s4090_s1 + $0x168] sm:$0xff]   ;;  %v2356_v57 = vld [vmem:[%s3467_s28 + $0x54] sm:$0xf] }
  0x38   : > { %2774 = vmatpush3.bf16.msra.mxu0 %v3085_v4  ;;  %v3106_v4 = vld [vmem:[%s3467_s28 + $0x38] ss:$0 sps:$4 sm:$0x11]  }
  0x39   : > { %2838 = vmatpush3.bf16.msra.mxu1 %v3086_v7  ;;  %2775 = vmatprep.subr.bf16.mxu0 %v3092_v10  ;;  %v546_v1 = vsel %vm534_vm0, %v544_v59, %v545_v56  ;;  %v455_v10 = vshrl.u32 %v2414_v3, 16  ;;  %v548_v16 = vrot.slane %v3106_v4, 1  ;;  %v3124_v56 = vld [vmem:[%s3467_s28 + $0x50] ss:$0 sps:$4 sm:$0x11]  }
  0x3a   : > { %2839 = vmatprep.subr.bf16.mxu1 %v3093_v12  ;;  %v462_v12 = vshll.u32 %v3106_v4, 16  ;;  %v3131_v4 = vld [vmem:[%s4090_s1 + $0x1b0] sm:$0xff]  }
  0x3b   : > { %1655 = vmatmul.mubr.bf16.gmra.mrb[4].mxu0 %v2411_v58  ;;  %v452_v58 = vrot.slane %v450_v53, 1  ;;  %v242_v53 = vld [vmem:[%s3467_s28 + $0x4c] sm:$0xf] }
  0x3c   : > { %1752 = vmatmul.mubr.bf16.gmra.mrb[4].mxu1 %v540_v14  ;;  %2776 = vmatpush3.bf16.msra.mxu0 %v3094_v21  ;;  %v3113_v14 = vld [vmem:[%s4090_s1 + $0x1a0] sm:$0xff]   ;;  %v464_v19 = vrot.slane %v462_v12, 1  ;;  %v547_v21 = vrot.slane %v2430_v15, 1  ;;  %v2416_v55 = vcombine.low %v241_v52, %v242_v53  ;;  %v2368_v12 = vld [vmem:[%s3467_s28 + $0xc] sm:$0xe]  ;;  %v3139_v15 = vld [vmem:[%s4090_s1 + $0x138] sm:$0xff]  }
  0x3d   : > { %1759 = vmatprep.mubr.bf16.mxu1 %v3545_v27  ;;  %2840 = vmatpush3.bf16.msra.mxu1 %v3095_v28  ;;  %v453_v7 = vsel %vm405_vm1, %v448_v61, %v452_v58  ;;  %v240_v28 = vld [vmem:[%s3467_s28 + $0x40] sm:$0xf]  ;;  %v3130_v58 = vld [vmem:[%s4090_s1 + $0x130] sm:$0xff]   ;;  %v259_v61 = vld [vmem:[%s3467_s28 + $0x48] sm:$0xe] }
  0x3e   : > { %2777 = vmatprep.subr.bf16.mxu0 %v3101_v31  ;;  %2841 = vmatprep.subr.bf16.mxu1 %v3102_v34  ;;  %v549_v26 = vsel %vm534_vm0, %v547_v21, %v548_v16  ;;  %v2415_v31 = vcombine.low %v239_v25, %v240_v28  ;;  %v3122_v34 = vld [vmem:[%s4090_s1 + $0x1a8] sm:$0xff]   ;;  %v479_v63 = vshrl.u32 %v2416_v55, 16  ;;  %v481_v0 = vshll.u32 %v2416_v55, 16  ;;  %v3672_v25 = vld [vmem:[%s3467_s28 + $0x64] sm:$0xf] }
  0x3f   : > { %1662 = vmatprep.mubr.bf16.mxu0 %v441_v44  ;;  %v551_v44 = vrot.slane %v3115_v32, 1  ;;  %v2432_v5 = vcombine.low %v259_v61, %v242_v53  ;;  %v2378_v52 = vld [vmem:[%s3467_s28 + $0x18] sm:$0xf]  ;;  %v3697_v53 = vld [vmem:[%s3467_s28 + $0x1c] sm:$0xf] }
  0x40   : > { %2778 = vmatpush3.bf16.msra.mxu0 %v3103_v36  ;;  %v258_v36 = vld [vmem:[%s3467_s28 + $0x3c] sm:$0xe]  ;;  %v467_v37 = vshrl.u32 %v2415_v31, 16  ;;  %v469_v39 = vshll.u32 %v2415_v31, 16  ;;  %v483_v9 = vrot.slane %v481_v0, 1 }
  0x41   : > { %2842 = vmatpush3.bf16.msra.mxu1 %v3104_v48  ;;  %2779 = vmatprep.subr.bf16.mxu0 %v3110_v54  ;;  %v2431_v43 = vcombine.low %v258_v36, %v240_v28  ;;  %v642_v28 = vshll.u32 %v3486_v42, 16 }
  0x42   : > { %2843 = vmatprep.subr.bf16.mxu1 %v3111_v60  ;;  %v3645_v60 = vld [vmem:[%s3467_s28 + $0x58] sm:$0xf]  ;;  %v484_v16 = vor.u32 %v483_v9, %v479_v63  ;;  %v2370_v9 = vld [vmem:[%s3467_s28 + $0x24] sm:$0xe] }
  0x43   : > { %1663 = vmatmul.mubr.bf16.gmra.mrb[8].mxu0 %v2412_v18  ;;  %v459_v18 = vrot.slane %v457_v11, 1  ;;  %v550_v48 = vrot.slane %v2431_v43, 1  ;;  %v3138_v11 = vld [vmem:[%s4090_s1 + $0x1f8] sm:$0xff]  }
  0x44   : > { %1760 = vmatmul.mubr.bf16.gmra.mrb[8].mxu1 %v543_v40  ;;  %1670 = vmatprep.mubr.bf16.mxu0 %v453_v7  ;;  %v474_v40 = vshll.u32 %v3115_v32, 16  ;;  %v3137_v7 = vld [vmem:[%s4090_s1 + $0x178] sm:$0xff]  }
  0x45   : > { %1767 = vmatprep.mubr.bf16.mxu1 %v3573_v49  ;;  %2780 = vmatpush3.bf16.msra.mxu0 %v3112_v6  ;;  %v460_v24 = vor.u32 %v459_v18, %v455_v10  ;;  %v552_v54 = vsel %vm534_vm0, %v550_v48, %v551_v44  ;;  %v554_v6 = vrot.slane %v3124_v56, 1 }
  0x46   : > { %2844 = vmatpush3.bf16.msra.mxu1 %v3113_v14  ;;  %2781 = vmatprep.subr.bf16.mxu0 %v3119_v17  ;;  %v476_v46 = vrot.slane %v474_v40, 1  ;;  %v553_v14 = vrot.slane %v2432_v5, 1  ;;  %v243_v17 = vld [vmem:[%s3467_s28 + $0x54] sm:$0xf]  ;;  %v654_v5 = vshll.u32 %v3515_v2, 16 }
  0x47   : > { %2845 = vmatprep.subr.bf16.mxu1 %v3120_v20  ;;  %v465_v30 = vsel %vm405_vm1, %v460_v24, %v464_v19  ;;  %v244_v19 = vld [vmem:[%s3467_s28 + $0x58] sm:$0xf]  ;;  %v2358_v20 = vld [vmem:[%s3467_s28 + $0x60] sm:$0xf] }
  0x48   : > { %v555_v18 = vsel %vm534_vm0, %v553_v14, %v554_v6  ;;  %v3133_v24 = vld [vmem:[%s3467_s28 + $0x5c] ss:$0 sps:$4 sm:$0x11]   ;;  %v3679_v29 = vcombine.low %v2358_v20, %v3672_v25  ;;  %v2380_v6 = vld [vmem:[%s3467_s28 + $0x24] sm:$0xf] }
  0x49   : > { %2782 = vmatpush3.bf16.msra.mxu0 %v3121_v23  ;;  %v2417_v23 = vcombine.low %v243_v17, %v244_v19  ;;  %v498_v36 = vshll.u32 %v3133_v24, 16  ;;  %v3718_v17 = vld [vmem:[%s3467_s28 + $0x2c] ss:$0 sps:$4 sm:$0x11]  }
  0x4a   : > { %2846 = vmatpush3.bf16.msra.mxu1 %v3122_v34  ;;  %2783 = vmatprep.subr.bf16.mxu0 %v3128_v41  ;;  %v557_v41 = vrot.slane %v3133_v24, 1  ;;  %v2382_v24 = vld [vmem:[%s3467_s28 + $0x30] sm:$0xf] }
  0x4b   : > { %1671 = vmatmul.mubr.bf16.gmra.mrb[12].mxu0 %v2413_v45  ;;  %v471_v45 = vrot.slane %v469_v39, 1  ;;  %2847 = vmatprep.subr.bf16.mxu1 %v3129_v50  ;;  %v491_v32 = vshrl.u32 %v2417_v23, 16  ;;  %v493_v34 = vshll.u32 %v2417_v23, 16  ;;  %v640_v39 = vshrl.u32 %v3486_v42, 16 }
  0x4c   : > { %1768 = vmatmul.mubr.bf16.gmra.mrb[12].mxu1 %v546_v1  ;;  %1678 = vmatprep.mubr.bf16.mxu0 %v465_v30  ;;  %v486_v1 = vshll.u32 %v3124_v56, 16  ;;  %v260_v30 = vld [vmem:[%s3467_s28 + $0x54] sm:$0xe]  ;;  %v500_v44 = vrot.slane %v498_v36, 1  ;;  %v2452_v36 = vcombine.low %v2370_v9, %v3541_v22 }
  0x4d   : > { %1775 = vmatprep.mubr.bf16.mxu1 %v3597_v13  ;;  %v472_v51 = vor.u32 %v471_v45, %v467_v37  ;;  %2784 = vmatpush3.bf16.msra.mxu0 %v3130_v58  ;;  %v3686_v37 = vld [vmem:[%s4090_s1 + $0x200] sm:$0xff]   ;;  %v2433_v40 = vcombine.low %v260_v30, %v244_v19  ;;  %v495_v43 = vrot.slane %v493_v34, 1  ;;  %v644_v45 = vrot.slane %v642_v28, 1  ;;  %v3141_v42 = vld [vmem:[%s3467_s28 + $0x14] ss:$0 sps:$4 sm:$0x11]  }
  0x4e   : > { %v488_v10 = vrot.slane %v486_v1, 1  ;;  %2848 = vmatpush3.bf16.msra.mxu1 %v3131_v4  ;;  %2785 = vmatprep.subr.bf16.mxu0 %v3137_v7  ;;  %v768_v56 = vrot.slane %v3141_v42, 1  ;;  %v3702_v58 = vld [vmem:[%s3467_s28 + $0x20] ss:$0 sps:$4 sm:$0x11]   ;;  %v656_v30 = vrot.slane %v654_v5, 1 }
  0x4f   : > { %v477_v59 = vsel %vm405_vm1, %v472_v51, %v476_v46  ;;  %2849 = vmatprep.subr.bf16.mxu1 %v3138_v11  ;;  %v556_v46 = vrot.slane %v2433_v40, 1  ;;  %v496_v48 = vor.u32 %v495_v43, %v491_v32  ;;  %v879_v1 = vshll.u32 %v3702_v58, 16  ;;  %v3145_v4 = vld [vmem:[%s3467_s28 + $0x20] ss:$0 sps:$4 sm:$0x11]   ;;  %v3148_v32 = vld [vmem:[%s4090_s1 + $0x208] sm:$0xff]  }
  0x50   : > { %v489_v21 = vsel %vm405_vm1, %v484_v16, %v488_v10  ;;  %v3711_v7 = vld [vmem:[%s3467_s28 + $0x28] sm:$0xf]  ;;  %v771_v16 = vrot.slane %v3145_v4, 1  ;;  %v3730_v34 = vld [vmem:[%s3467_s28 + $0x34] sm:$0xf] }
  0x51   : > { %2786 = vmatpush3.bf16.msra.mxu0 %v3139_v15  ;;  %v558_v51 = vsel %vm534_vm0, %v556_v46, %v557_v41  ;;  %v3715_v11 = vcombine.low %v2380_v6, %v3711_v7  ;;  %v3738_v41 = vld [vmem:[%s3467_s28 + $0x38] ss:$0 sps:$4 sm:$0x11]  }
  0x52   : > { %2915 = vmatprep.subr.bf16.mxu0 %v3686_v37 }
  0x53   : > { %1679 = vmatmul.mubr.bf16.gmra.mrb[16].mxu0 %v2414_v3  ;;  %v3649_v3 = vcombine.low %v2356_v57, %v3645_v60  ;;  %v2458_v57 = vcombine.low %v2378_v52, %v3697_v53  ;;  %v884_v19 = vshrl.u32 %v3715_v11, 16  ;;  %v886_v20 = vshll.u32 %v3715_v11, 16  ;;  %v3152_v52 = vld [vmem:[%s4090_s1 + $0x210] sm:$0xff]  }
  0x54   : > { %1776 = vmatmul.mubr.bf16.gmra.mrb[16].mxu1 %v549_v26  ;;  %1686 = vmatprep.mubr.bf16.mxu0 %v477_v59  ;;  %v3140_v26 = vld [vmem:[%s4090_s1 + $0x1b8] sm:$0xff]  }
  0x55   : > { %1783 = vmatprep.mubr.bf16.mxu1 %v3625_v35  ;;  %2850 = vmatpush3.bf16.msra.mxu1 %v3140_v26  ;;  %v872_v63 = vshrl.u32 %v2458_v57, 16  ;;  %v874_v0 = vshll.u32 %v2458_v57, 16  ;;  %v888_v28 = vrot.slane %v886_v20, 1  ;;  %v3778_v20 = vld [vmem:[%s3467_s28 + $0x4c] sm:$0xf] }
  0x56   : > { %2947 = vmatprep.subr.bf16.mxu1 %v3686_v37 }
  0x57   : > { %v876_v10 = vrot.slane %v874_v0, 1  ;;  %v889_v43 = vor.u32 %v888_v28, %v884_v19  ;;  %v3756_v0 = vld [vmem:[%s3467_s28 + $0x40] sm:$0xf]  ;;  %v2386_v19 = vld [vmem:[%s3467_s28 + $0x48] sm:$0xf] }
  0x5b   : > { %1687 = vmatmul.mubr.bf16.gmra.mrb[20].mxu0 %v2415_v31  ;;  %v2450_v31 = vcombine.low %v2368_v12, %v3483_v38  ;;  %v2369_v38 = vld [vmem:[%s3467_s28 + $0x18] sm:$0xe]  ;;  %v645_v12 = vor.u32 %v644_v45, %v640_v39  ;;  %v666_v45 = vshll.u32 %v3545_v27, 16 }
  0x5c   : > { %1784 = vmatmul.mubr.bf16.gmra.mrb[20].mxu1 %v552_v54  ;;  %1694 = vmatprep.mubr.bf16.mxu0 %v489_v21  ;;  %v501_v54 = vsel %vm405_vm1, %v496_v48, %v500_v44  ;;  %v2451_v59 = vcombine.low %v2369_v38, %v3512_v62  ;;  %v881_v62 = vrot.slane %v879_v1, 1  ;;  %v891_v21 = vshll.u32 %v3718_v17, 16  ;;  %v3149_v44 = vld [vmem:[%s3467_s28 + $0x2c] ss:$0 sps:$4 sm:$0x11]  }
  0x5d   : > { %1791 = vmatprep.mubr.bf16.mxu1 %v3649_v3  ;;  %v767_v50 = vrot.slane %v2450_v31, 1  ;;  %v659_v31 = vshll.u32 %v3145_v4, 16  ;;  %v903_v48 = vshll.u32 %v3738_v41, 16  ;;  %v668_v4 = vrot.slane %v666_v45, 1  ;;  %v3795_v45 = vld [vmem:[%s3467_s28 + $0x58] sm:$0xf] }
  0x5e   : > { %v770_v15 = vrot.slane %v2451_v59, 1  ;;  %v893_v40 = vrot.slane %v891_v21, 1  ;;  %v2384_v59 = vld [vmem:[%s3467_s28 + $0x3c] sm:$0xf]  ;;  %v671_v9 = vshll.u32 %v3149_v44, 16  ;;  %v678_v21 = vshll.u32 %v3573_v49, 16 }
  0x5f   : > { %v769_v61 = vsel %vm534_vm0, %v767_v50, %v768_v56  ;;  %v3759_v5 = vcombine.low %v2384_v59, %v3756_v0 }
  0x60   : > { %v772_v38 = vsel %vm534_vm0, %v770_v15, %v771_v16 }
  0x63   : > { %1695 = vmatmul.mubr.bf16.gmra.mrb[24].mxu0 %v2416_v55  ;;  %v647_v55 = vshll.u32 %v3141_v42, 16  ;;  %v894_v42 = vsel %vm405_vm1, %v889_v43, %v893_v40 }
  0x64   : > { %1792 = vmatmul.mubr.bf16.gmra.mrb[24].mxu1 %v555_v18  ;;  %1702 = vmatprep.mubr.bf16.mxu0 %v501_v54  ;;  %v877_v18 = vor.u32 %v876_v10, %v872_v63  ;;  %v2371_v54 = vld [vmem:[%s3467_s28 + $0x30] sm:$0xe]  ;;  %v664_v63 = vshrl.u32 %v3545_v27, 16  ;;  %v3156_v27 = vld [vmem:[%s4090_s1 + $0x218] sm:$0xff]  }
  0x65   : > { %1799 = vmatprep.mubr.bf16.mxu1 %v3679_v29  ;;  %v649_v14 = vrot.slane %v647_v55, 1  ;;  %v773_v55 = vrot.slane %v2452_v36, 1  ;;  %v2453_v16 = vcombine.low %v2371_v54, %v3567_v47  ;;  %v3785_v47 = vld [vmem:[%s3467_s28 + $0x50] ss:$0 sps:$4 sm:$0x11]  }
  0x66   : > { %v882_v26 = vsel %vm405_vm1, %v877_v18, %v881_v62  ;;  %v3153_v62 = vld [vmem:[%s3467_s28 + $0x38] ss:$0 sps:$4 sm:$0x11]   ;;  %v669_v28 = vor.u32 %v668_v4, %v664_v63  ;;  %v2372_v36 = vld [vmem:[%s3467_s28 + $0x3c] sm:$0xe] }
  0x67   : > { %v650_v39 = vsel %vm405_vm1, %v645_v12, %v649_v14  ;;  %v908_v12 = vshrl.u32 %v3759_v5, 16  ;;  %v910_v14 = vshll.u32 %v3759_v5, 16  ;;  %v777_v40 = vrot.slane %v3153_v62, 1  ;;  %v3157_v54 = vld [vmem:[%s3467_s28 + $0x44] ss:$0 sps:$4 sm:$0x11]  }
  0x6b   : > { %1703 = vmatmul.mubr.bf16.gmra.mrb[28].mxu0 %v2417_v23  ;;  %v652_v23 = vshrl.u32 %v3515_v2, 16  ;;  %v3735_v2 = vcombine.low %v2382_v24, %v3730_v34 }
  0x6c   : > { %1800 = vmatmul.mubr.bf16.gmra.mrb[28].mxu1 %v558_v51  ;;  %1840 = vmatprep.mubr.bf16.mxu0 %v769_v61  ;;  %v661_v51 = vrot.slane %v659_v31, 1  ;;  %v774_v61 = vrot.slane %v3149_v44, 1  ;;  %v2388_v44 = vld [vmem:[%s3467_s28 + $0x54] sm:$0xf] }
  0x6d   : > { %1937 = vmatprep.mubr.bf16.mxu1 %v882_v26  ;;  %v896_v22 = vshrl.u32 %v3735_v2, 16  ;;  %v898_v46 = vshll.u32 %v3735_v2, 16  ;;  %v657_v50 = vor.u32 %v656_v30, %v652_v23  ;;  %v912_v23 = vrot.slane %v910_v14, 1 }
  0x6e   : > { %v775_v18 = vsel %vm534_vm0, %v773_v55, %v774_v61  ;;  %v3782_v26 = vcombine.low %v2386_v19, %v3778_v20  ;;  %v673_v30 = vrot.slane %v671_v9, 1  ;;  %v3164_v55 = vld [vmem:[%s4090_s1 + $0x228] sm:$0xff]   ;;  %v690_v61 = vshll.u32 %v3597_v13, 16  ;;  %v3821_v9 = vld [vmem:[%s3467_s28 + $0x64] sm:$0xf] }
  0x6f   : > { %v900_v56 = vrot.slane %v898_v46, 1  ;;  %v662_v6 = vsel %vm405_vm1, %v657_v50, %v661_v51  ;;  %v913_v31 = vor.u32 %v912_v23, %v908_v12  ;;  %v676_v51 = vshrl.u32 %v3573_v49, 16  ;;  %v3812_v49 = vld [vmem:[%s3467_s28 + $0x5c] ss:$0 sps:$4 sm:$0x11]  }
  0x70   : > { %v920_v43 = vshrl.u32 %v3782_v26, 16  ;;  %v674_v50 = vsel %vm405_vm1, %v669_v28, %v673_v30  ;;  %v695_v12 = vshll.u32 %v3157_v54, 16  ;;  %v3161_v28 = vld [vmem:[%s3467_s28 + $0x50] ss:$0 sps:$4 sm:$0x11]  }
  0x71   : > { %v901_v1 = vor.u32 %v900_v56, %v896_v22  ;;  %v2454_v56 = vcombine.low %v2372_v36, %v3593_v8  ;;  %v2390_v8 = vld [vmem:[%s3467_s28 + $0x60] sm:$0xf] }
  0x72   : > { %v3828_v19 = vcombine.low %v2390_v8, %v3821_v9  ;;  %v697_v36 = vrot.slane %v695_v12, 1  ;;  %v3165_v8 = vld [vmem:[%s3467_s28 + $0x5c] ss:$0 sps:$4 sm:$0x11]  }
  0x73   : > { %1841 = vmatmul.mubr.bf16.vlgmr.msra.gmra.mrb[32].mxu0 %v650_v39  ;;  %v776_v39 = vrot.slane %v2453_v16, 1  ;;  %v939_v16 = vshll.u32 %v3812_v49, 16 }
  0x74   : > { %1938 = vmatmul.mubr.bf16.vlgmr.msra.gmra.mrb[32].mxu1 %v2458_v57  ;;  %2916 = vmatpush3.bf16.msra.mxu0 %v3686_v37  ;;  %v905_v57 = vrot.slane %v903_v48, 1  ;;  %v927_v48 = vshll.u32 %v3785_v47, 16 }
  0x75   : > { %2955 = vmatpush3.bf16.msra.mxu1 %v3686_v37  ;;  %1848 = vmatprep.mubr.bf16.mxu0 %v772_v38  ;;  %v3762_v37 = vld [vmem:[%s3467_s28 + $0x44] ss:$0 sps:$4 sm:$0x11]   ;;  %v683_v38 = vshll.u32 %v3153_v62, 16  ;;  %v780_v62 = vrot.slane %v3157_v54, 1 }
  0x76   : > { %2948 = vmatprep.subr.bf16.mxu1 %v3148_v32  ;;  %1945 = vmatprep.mubr.bf16.mxu1 %v894_v42  ;;  %v906_v10 = vsel %vm405_vm1, %v901_v1, %v905_v57  ;;  %v915_v15 = vshll.u32 %v3762_v37, 16  ;;  %v3800_v42 = vcombine.low %v2388_v44, %v3795_v45  ;;  %v778_v57 = vsel %vm534_vm0, %v776_v39, %v777_v40  ;;  %v3841_v40 = vld [vmem:[%s3467_s28 + $0x68] ss:$0 sps:$4 sm:$0x11]   ;;  %v2403_v44 = vld [vmem:[%s3467_s28 + $0x24] sm:$0xe] }
  0x77   : > { %2917 = vmatprep.subr.bf16.mxu0 %v3148_v32  ;;  %v685_v63 = vrot.slane %v683_v38, 1  ;;  %v929_v4 = vrot.slane %v927_v48, 1  ;;  %v2392_v38 = vld [vmem:[%s3467_s28 + $0x6c] sm:$0xf]  ;;  %v2374_v48 = vld [vmem:[%s3467_s28 + $0x54] sm:$0xe]  ;;  %v2475_v54 = vcombine.low %v2403_v44, %v3711_v7 }
  0x78   : > { %2918 = vmatpush3.bf16.msra.mxu0 %v3148_v32  ;;  %v917_v24 = vrot.slane %v915_v15, 1  ;;  %v934_v59 = vshll.u32 %v3800_v42, 16  ;;  %v932_v14 = vshrl.u32 %v3800_v42, 16 }
  0x79   : > { %2956 = vmatpush3.bf16.msra.mxu1 %v3148_v32  ;;  %2919 = vmatprep.subr.bf16.mxu0 %v3152_v52  ;;  %v922_v32 = vshll.u32 %v3782_v26, 16 }
  0x7a   : > { %2949 = vmatprep.subr.bf16.mxu1 %v3152_v52  ;;  %v918_v22 = vsel %vm405_vm1, %v913_v31, %v917_v24  ;;  %v936_v15 = vrot.slane %v934_v59, 1  ;;  %v688_v24 = vshrl.u32 %v3597_v13, 16  ;;  %v941_v13 = vrot.slane %v939_v16, 1 }
  0x7b   : > { %1849 = vmatmul.mubr.bf16.gmra.mrb[36].mxu0 %v662_v6  ;;  %v924_v46 = vrot.slane %v922_v32, 1  ;;  %v702_v32 = vshll.u32 %v3625_v35, 16  ;;  %v1003_v59 = vrot.slane %v3718_v17, 1 }
  0x7c   : > { %1946 = vmatmul.mubr.bf16.gmra.mrb[36].mxu1 %v3715_v11  ;;  %v3160_v11 = vld [vmem:[%s4090_s1 + $0x220] sm:$0xff]   ;;  %1856 = vmatprep.mubr.bf16.mxu0 %v775_v18  ;;  %v937_v39 = vor.u32 %v936_v15, %v932_v14  ;;  %v786_v14 = vrot.slane %v3165_v8, 1 }
  0x7d   : > { %1953 = vmatprep.mubr.bf16.mxu1 %v906_v10  ;;  %2957 = vmatpush3.bf16.msra.mxu1 %v3152_v52  ;;  %v925_v1 = vor.u32 %v924_v46, %v920_v43  ;;  %v779_v10 = vrot.slane %v2454_v56, 1  ;;  %v3846_v43 = vld [vmem:[%s3467_s28 + $0x70] sm:$0xf]  ;;  %v783_v46 = vrot.slane %v3161_v28, 1  ;;  %v951_v56 = vshll.u32 %v3841_v40, 16 }
  0x7e   : > { %2950 = vmatprep.subr.bf16.mxu1 %v3156_v27  ;;  %2920 = vmatpush3.bf16.msra.mxu0 %v3152_v52  ;;  %v680_v52 = vrot.slane %v678_v21, 1  ;;  %v3172_v21 = vld [vmem:[%s4090_s1 + $0x238] sm:$0xff]   ;;  %v2375_v15 = vld [vmem:[%s3467_s28 + $0x60] sm:$0xe] }
  0x7f   : > { %2921 = vmatprep.subr.bf16.mxu0 %v3156_v27  ;;  %v930_v18 = vsel %vm405_vm1, %v925_v1, %v929_v4  ;;  %v781_v31 = vsel %vm534_vm0, %v779_v10, %v780_v62  ;;  %v707_v1 = vshll.u32 %v3161_v28, 16  ;;  %v2456_v4 = vcombine.low %v2374_v48, %v3645_v60 }
  0x80   : > { %v681_v6 = vor.u32 %v680_v52, %v676_v51  ;;  %v700_v51 = vshrl.u32 %v3625_v35, 16  ;;  %v944_v52 = vshrl.u32 %v3828_v19, 16  ;;  %v1002_v35 = vrot.slane %v2475_v54, 1 }
  0x81   : > { %2958 = vmatpush3.bf16.msra.mxu1 %v3156_v27  ;;  %v714_v62 = vshll.u32 %v3649_v3, 16  ;;  %v785_v12 = vrot.slane %v2456_v4, 1  ;;  %v2404_v4 = vld [vmem:[%s3467_s28 + $0x30] sm:$0xe] }
  0x82   : > { %2951 = vmatprep.subr.bf16.mxu1 %v3160_v11  ;;  %2922 = vmatpush3.bf16.msra.mxu0 %v3156_v27  ;;  %v2373_v27 = vld [vmem:[%s3467_s28 + $0x48] sm:$0xe]  ;;  %v686_v23 = vsel %vm405_vm1, %v681_v6, %v685_v63  ;;  %v704_v63 = vrot.slane %v702_v32, 1  ;;  %v953_v6 = vrot.slane %v951_v56, 1 }
  0x83   : > { %2923 = vmatprep.subr.bf16.mxu0 %v3160_v11  ;;  %1857 = vmatmul.mubr.bf16.gmra.mrb[40].mxu0 %v674_v50  ;;  %v2455_v30 = vcombine.low %v2373_v27, %v3619_v33  ;;  %v946_v33 = vshll.u32 %v3828_v19, 16  ;;  %v942_v50 = vsel %vm405_vm1, %v937_v39, %v941_v13  ;;  %v3868_v27 = vld [vmem:[%s3467_s28 + $0x74] ss:$0 sps:$4 sm:$0x11]   ;;  %v716_v28 = vrot.slane %v714_v62, 1 }
  0x84   : > { %1954 = vmatmul.mubr.bf16.gmra.mrb[40].mxu1 %v3735_v2  ;;  %v3168_v2 = vld [vmem:[%s4090_s1 + $0x230] sm:$0xff]   ;;  %1864 = vmatprep.mubr.bf16.mxu0 %v778_v57  ;;  %v3856_v57 = vcombine.low %v2392_v38, %v3846_v43  ;;  %v705_v60 = vor.u32 %v704_v63, %v700_v51  ;;  %v787_v32 = vsel %vm534_vm0, %v785_v12, %v786_v14  ;;  %v2409_v62 = vld [vmem:[%s3467_s28 + $0x6c] sm:$0xe] }
  0x85   : > { %1961 = vmatprep.mubr.bf16.mxu1 %v918_v22  ;;  %2959 = vmatpush3.bf16.msra.mxu1 %v3160_v11  ;;  %v782_v22 = vrot.slane %v2455_v30, 1  ;;  %v719_v30 = vshll.u32 %v3165_v8, 16  ;;  %v2481_v12 = vcombine.low %v2409_v62, %v3846_v43 }
  0x86   : > { %2952 = vmatprep.subr.bf16.mxu1 %v3164_v55  ;;  %2924 = vmatpush3.bf16.msra.mxu0 %v3160_v11  ;;  %v692_v11 = vrot.slane %v690_v61, 1  ;;  %v958_v10 = vshll.u32 %v3856_v57, 16 }
  0x87   : > { %2925 = vmatprep.subr.bf16.mxu0 %v3164_v55  ;;  %v784_v7 = vsel %vm534_vm0, %v782_v22, %v783_v46  ;;  %v721_v38 = vrot.slane %v719_v30, 1  ;;  %v2402_v46 = vld [vmem:[%s3467_s28 + $0x18] sm:$0xe] }
  0x89   : > { %2960 = vmatpush3.bf16.msra.mxu1 %v3164_v55 }
  0x8a   : > { %2953 = vmatprep.subr.bf16.mxu1 %v3168_v2  ;;  %2926 = vmatpush3.bf16.msra.mxu0 %v3164_v55  ;;  %v948_v55 = vrot.slane %v946_v33, 1  ;;  %v726_v33 = vshll.u32 %v3679_v29, 16 }
  0x8b   : > { %2927 = vmatprep.subr.bf16.mxu0 %v3168_v2  ;;  %1865 = vmatmul.mubr.bf16.gmra.mrb[44].mxu0 %v686_v23  ;;  %v963_v23 = vshll.u32 %v3868_v27, 16 }
  0x8c   : > { %1962 = vmatmul.mubr.bf16.gmra.mrb[44].mxu1 %v3759_v5  ;;  %1872 = vmatprep.mubr.bf16.mxu0 %v781_v31  ;;  %v693_v5 = vor.u32 %v692_v11, %v688_v24  ;;  %v949_v17 = vor.u32 %v948_v55, %v944_v52  ;;  %v712_v11 = vshrl.u32 %v3649_v3, 16  ;;  %v2457_v31 = vcombine.low %v2375_v15, %v3672_v25  ;;  %v2406_v3 = vld [vmem:[%s3467_s28 + $0x48] sm:$0xe] }
  0x8d   : > { %1969 = vmatprep.mubr.bf16.mxu1 %v930_v18  ;;  %2961 = vmatpush3.bf16.msra.mxu1 %v3168_v2  ;;  %v956_v18 = vshrl.u32 %v3856_v57, 16  ;;  %v965_v13 = vrot.slane %v963_v23, 1  ;;  %v728_v51 = vrot.slane %v726_v33, 1  ;;  %v2474_v55 = vcombine.low %v2402_v46, %v3697_v53 }
  0x8e   : > { %2954 = vmatprep.subr.bf16.mxu1 %v3172_v21  ;;  %2928 = vmatpush3.bf16.msra.mxu0 %v3168_v2  ;;  %v698_v61 = vsel %vm405_vm1, %v693_v5, %v697_v36  ;;  %v3865_v2 = vsel %vm534_vm0, %v1002_v35, %v1003_v59  ;;  %v954_v16 = vsel %vm405_vm1, %v949_v17, %v953_v6  ;;  %v3169_v36 = vld [vmem:[%s3467_s28 + $0x68] ss:$0 sps:$4 sm:$0x11]   ;;  %v788_v44 = vrot.slane %v2457_v31, 1 }
  0x8f   : > { %2929 = vmatprep.subr.bf16.mxu0 %v3172_v21  ;;  %v717_v5 = vor.u32 %v716_v28, %v712_v11  ;;  %v789_v22 = vrot.slane %v3169_v36, 1  ;;  %v731_v52 = vshll.u32 %v3169_v36, 16  ;;  %v1012_v59 = vrot.slane %v3785_v47, 1 }
  0x90   : > { %v1000_v35 = vrot.slane %v3702_v58, 1  ;;  %v2476_v17 = vcombine.low %v2404_v4, %v3730_v34  ;;  %v1015_v58 = vrot.slane %v3812_v49, 1  ;;  %v1020_v15 = vrot.slane %v2481_v12, 1 }
  0x91   : > { %2962 = vmatpush3.bf16.msra.mxu1 %v3172_v21  ;;  %v722_v48 = vsel %vm405_vm1, %v717_v5, %v721_v38  ;;  %v790_v54 = vsel %vm534_vm0, %v788_v44, %v789_v22  ;;  %v733_v63 = vrot.slane %v731_v52, 1 }
  0x92   : > { %2930 = vmatpush3.bf16.msra.mxu0 %v3172_v21  ;;  %v960_v21 = vrot.slane %v958_v10, 1  ;;  %v1018_v10 = vrot.slane %v3841_v40, 1  ;;  %v1021_v40 = vrot.slane %v3868_v27, 1  ;;  %v3922_v27 = vld [vmem:[%s4091_s2] ss:$0 sm:$0xff] }
  0x93   : > { %1873 = vmatmul.mubr.bf16.gmra.mrb[48].mxu0 %v698_v61 }
  0x94   : > { %1970 = vmatmul.mubr.bf16.gmra.mrb[48].mxu1 %v3782_v26  ;;  %1880 = vmatprep.mubr.bf16.mxu0 %v784_v7  ;;  %v709_v26 = vrot.slane %v707_v1, 1  ;;  %v961_v39 = vor.u32 %v960_v21, %v956_v18  ;;  %v2408_v1 = vld [vmem:[%s3467_s28 + $0x60] sm:$0xe]  ;;  %v1022_v18 = vsel %vm534_vm0, %v1020_v15, %v1021_v40 }
  0x95   : > { %1977 = vmatprep.mubr.bf16.mxu1 %v942_v50  ;;  %v724_v50 = vshrl.u32 %v3679_v29, 16  ;;  %v999_v29 = vrot.slane %v2474_v55, 1  ;;  %v2480_v53 = vcombine.low %v2408_v1, %v3821_v9  ;;  %v1006_v9 = vrot.slane %v3738_v41, 1 }
  0x96   : > { %v710_v24 = vsel %vm405_vm1, %v705_v60, %v709_v26  ;;  %v966_v25 = vsel %vm405_vm1, %v961_v39, %v965_v13  ;;  %v1005_v60 = vrot.slane %v2476_v17, 1  ;;  %v2405_v26 = vld [vmem:[%s3467_s28 + $0x3c] sm:$0xe] }
  0x97   : > { %v729_v61 = vor.u32 %v728_v51, %v724_v50  ;;  %v1001_v47 = vsel %vm534_vm0, %v999_v29, %v1000_v35  ;;  %v2477_v14 = vcombine.low %v2405_v26, %v3756_v0 }
  0x98   : > { %v1007_v49 = vsel %vm534_vm0, %v1005_v60, %v1006_v9 }
  0x99   : > { %v734_v8 = vsel %vm405_vm1, %v729_v61, %v733_v63  ;;  %v1008_v41 = vrot.slane %v2477_v14, 1 }
  0x9b   : > { %1881 = vmatmul.mubr.bf16.gmra.mrb[52].mxu0 %v710_v24 }
  0x9c   : > { %1978 = vmatmul.mubr.bf16.gmra.mrb[52].mxu1 %v3800_v42  ;;  %1888 = vmatprep.mubr.bf16.mxu0 %v787_v32  ;;  %v2478_v42 = vcombine.low %v2406_v3, %v3778_v20  ;;  %v2407_v20 = vld [vmem:[%s3467_s28 + $0x54] sm:$0xe]  ;;  %s3185_s28 = sshll.u32 %s3277_s6, 4  ;;  %s3186_s28 = int_to_ptr.vmem [resolvable:$false] %s3185_s28 }
  0x9d   : > { %1985 = vmatprep.mubr.bf16.mxu1 %v954_v16  ;;  %v1009_v16 = vrot.slane %v3762_v37, 1  ;;  %s3187_s7 = scalar_lea.vmem %s3186_s28, 2048  ;;  %p3188_p2 = scmp.lt.s32.totalorder %s4030_s27, %s3186_s28 }
  0x9e   : > { %v1011_v56 = vrot.slane %v2478_v42, 1  ;;  %p3189_p4 = scmp.lt.s32.totalorder %s3187_s7, %s3181_s29 }
  0x9f   : > { %v1010_v43 = vsel %vm534_vm0, %v1008_v41, %v1009_v16 }
  0xa0   : > { %v1013_v7 = vsel %vm534_vm0, %v1011_v56, %v1012_v59  ;;  %p3190_p5 = por %p3189_p4, %p3188_p2 }
  0xa2   : > { %p3191_p6 = pnand %p3190_p5, %p3184_p1 }
  0xa3   : > { %1889 = vmatmul.mubr.bf16.gmra.mrb[56].mxu0 %v722_v48 }
  0xa4   : > { %1986 = vmatmul.mubr.bf16.gmra.mrb[56].mxu1 %v3828_v19  ;;  %1896 = vmatprep.mubr.bf16.mxu0 %v790_v54  ;;  %v2479_v19 = vcombine.low %v2407_v20, %v3795_v45  ;;  %v1017_v45 = vrot.slane %v2480_v53, 1 }
  0xa5   : > { %1993 = vmatprep.mubr.bf16.mxu1 %v966_v25 }
  0xa6   : > { %v1014_v6 = vrot.slane %v2479_v19, 1  ;;  %v1019_v34 = vsel %vm534_vm0, %v1017_v45, %v1018_v10 }
  0xab   : > { %1897 = vmatmul.mubr.bf16.gmra.mrb[60].mxu0 %v734_v8 }
  0xac   : > { %1994 = vmatmul.mubr.bf16.gmra.mrb[60].mxu1 %v3856_v57  ;;  %2931 = vmatprep.mubr.bf16.mxu0 %v1001_v47  ;;  %v1016_v57 = vsel %vm534_vm0, %v1014_v6, %v1015_v58 }
  0xad   : > { %2939 = vmatprep.mubr.bf16.mxu1 %v1013_v7 }
  0xb3   : > { %2932 = vmatmul.mubr.bf16.vlgmr.msra.gmra.mrb[64].mxu0 %v3865_v2 }
  0xb4   : > { %2940 = vmatmul.mubr.bf16.vlgmr.msra.gmra.mrb[64].mxu1 %v1016_v57  ;;  %2935 = vmatprep.mubr.bf16.mxu0 %v1007_v49 }
  0xb5   : > { %2943 = vmatprep.mubr.bf16.mxu1 %v1019_v34 }
  0xbb   : > { %2936 = vmatmul.mubr.bf16.gmra.mrb[68].mxu0 %v1010_v43 }
  0xbc   : > { %2944 = vmatmul.mubr.bf16.gmra.mrb[68].mxu1 %v1022_v18 }
 0x106   : > { %v2659_v23 = vpop.f32.mrb[0].mxu0 }
 0x107   : > { %v2723_v0 = vpop.f32.mrb[0].mxu1  ;;  %v2660_v2 = vpop.f32.mrb[1].mxu0 }
 0x108   : > { %v2724_v21 = vpop.f32.mrb[1].mxu1  ;;  %v2661_v30 = vadd.f32 %v2660_v2, %v2659_v23  ;;  %v2662_v37 = vpop.f32.mrb[2].mxu0 }
 0x109   : > { %v2725_v24 = vadd.f32 %v2724_v21, %v2723_v0  ;;  %v2726_v11 = vpop.f32.mrb[2].mxu1  ;;  %v2663_v32 = vpop.f32.mrb[3].mxu0 }
 0x10a   : > { %v2727_v28 = vpop.f32.mrb[3].mxu1  ;;  %v1649_v36 = vadd.f32 %v2661_v30, %v3922_v27  ;;  %v2664_v39 = vadd.f32 %v2663_v32, %v2662_v37 }
 0x10b   : > { %v2728_v31 = vadd.f32 %v2727_v28, %v2726_v11 }
 0x10c   : > { %v3925_v13 = vadd.f32 %v2725_v24, %v1649_v36  ;;  %v1652_v33 = vadd.f32 %v2664_v39, %v3922_v27 }
 0x10e   : > { %v3928_v3 = vadd.f32 %v2728_v31, %v1652_v33  ;;  %v2665_v44 = vpop.f32.mrb[4].mxu0 }
 0x10f   : > { %v2729_v5 = vpop.f32.mrb[4].mxu1  ;;  %v2666_v25 = vpop.f32.mrb[5].mxu0 }
 0x110   : > { %v2730_v38 = vpop.f32.mrb[5].mxu1  ;;  %v2667_v48 = vadd.f32 %v2666_v25, %v2665_v44  ;;  %v2668_v50 = vpop.f32.mrb[6].mxu0 }
 0x111   : > { %v2731_v22 = vadd.f32 %v2730_v38, %v2729_v5  ;;  %v2732_v46 = vpop.f32.mrb[6].mxu1  ;;  %v2669_v52 = vpop.f32.mrb[7].mxu0 }
 0x112   : > { %v2733_v42 = vpop.f32.mrb[7].mxu1  ;;  %v1657_v54 = vadd.f32 %v2667_v48, %v3922_v27  ;;  %v2670_v55 = vadd.f32 %v2669_v52, %v2668_v50 }
 0x113   : > { %v2734_v51 = vadd.f32 %v2733_v42, %v2732_v46 }
 0x114   : > { %v3931_v56 = vadd.f32 %v2731_v22, %v1657_v54  ;;  %v1660_v59 = vadd.f32 %v2670_v55, %v3922_v27 }
 0x116   : > { %v3934_v63 = vadd.f32 %v2734_v51, %v1660_v59  ;;  %v2671_v1 = vpop.f32.mrb[8].mxu0 }
 0x117   : > { %v2735_v20 = vpop.f32.mrb[8].mxu1  ;;  %v2672_v19 = vpop.f32.mrb[9].mxu0 }
 0x118   : > { %v2736_v61 = vpop.f32.mrb[9].mxu1  ;;  %v2673_v7 = vadd.f32 %v2672_v19, %v2671_v1  ;;  %v2674_v53 = vpop.f32.mrb[10].mxu0 }
 0x119   : > { %v2737_v29 = vadd.f32 %v2736_v61, %v2735_v20  ;;  %v2738_v35 = vpop.f32.mrb[10].mxu1  ;;  %v2675_v47 = vpop.f32.mrb[11].mxu0 }
 0x11a   : > { %v2739_v4 = vpop.f32.mrb[11].mxu1  ;;  %v1665_v17 = vadd.f32 %v2673_v7, %v3922_v27  ;;  %v2676_v6 = vadd.f32 %v2675_v47, %v2674_v53 }
 0x11b   : > { %v2740_v8 = vadd.f32 %v2739_v4, %v2738_v35 }
 0x11c   : > { %v3937_v58 = vadd.f32 %v2737_v29, %v1665_v17  ;;  %v1668_v45 = vadd.f32 %v2676_v6, %v3922_v27 }
 0x11e   : > { %v3940_v60 = vadd.f32 %v2740_v8, %v1668_v45  ;;  %v2677_v9 = vpop.f32.mrb[12].mxu0 }
 0x11f   : > { %v2741_v10 = vpop.f32.mrb[12].mxu1  ;;  %v2678_v12 = vpop.f32.mrb[13].mxu0 }
 0x120   : > { %v2742_v62 = vpop.f32.mrb[13].mxu1  ;;  %v2679_v14 = vadd.f32 %v2678_v12, %v2677_v9  ;;  %v2680_v49 = vpop.f32.mrb[14].mxu0 }
 0x121   : > { %v2743_v26 = vadd.f32 %v2742_v62, %v2741_v10  ;;  %v2744_v57 = vpop.f32.mrb[14].mxu1  ;;  %v2681_v40 = vpop.f32.mrb[15].mxu0 }
 0x122   : > { %v2745_v34 = vpop.f32.mrb[15].mxu1  ;;  %v1673_v41 = vadd.f32 %v2679_v14, %v3922_v27  ;;  %v2682_v16 = vadd.f32 %v2681_v40, %v2680_v49 }
 0x123   : > { %v2746_v15 = vadd.f32 %v2745_v34, %v2744_v57 }
 0x124   : > { %v3943_v18 = vadd.f32 %v2743_v26, %v1673_v41  ;;  %v1676_v43 = vadd.f32 %v2682_v16, %v3922_v27 }
 0x126   : > { %v3946_v23 = vadd.f32 %v2746_v15, %v1676_v43  ;;  %v2683_v24 = vpop.f32.mrb[16].mxu0 }
 0x127   : > { %v2747_v0 = vpop.f32.mrb[16].mxu1  ;;  %v2684_v28 = vpop.f32.mrb[17].mxu0 }
 0x128   : > { %v2748_v21 = vpop.f32.mrb[17].mxu1  ;;  %v2685_v37 = vadd.f32 %v2684_v28, %v2683_v24  ;;  %v2686_v31 = vpop.f32.mrb[18].mxu0 }
 0x129   : > { %v2749_v11 = vadd.f32 %v2748_v21, %v2747_v0  ;;  %v2750_v2 = vpop.f32.mrb[18].mxu1  ;;  %v2687_v36 = vpop.f32.mrb[19].mxu0 }
 0x12a   : > { %v2751_v30 = vpop.f32.mrb[19].mxu1  ;;  %v1681_v39 = vadd.f32 %v2685_v37, %v3922_v27  ;;  %v2688_v33 = vadd.f32 %v2687_v36, %v2686_v31 }
 0x12b   : > { %v2752_v32 = vadd.f32 %v2751_v30, %v2750_v2 }
 0x12c   : > { %v3949_v5 = vadd.f32 %v2749_v11, %v1681_v39  ;;  %v1684_v38 = vadd.f32 %v2688_v33, %v3922_v27 }
 0x12e   : > { %v3952_v46 = vadd.f32 %v2752_v32, %v1684_v38  ;;  %v2689_v25 = vpop.f32.mrb[20].mxu0 }
 0x12f   : > { %v2753_v44 = vpop.f32.mrb[20].mxu1  ;;  %v2690_v50 = vpop.f32.mrb[21].mxu0 }
 0x130   : > { %v2754_v22 = vpop.f32.mrb[21].mxu1  ;;  %v2691_v52 = vadd.f32 %v2690_v50, %v2689_v25  ;;  %v2692_v54 = vpop.f32.mrb[22].mxu0 }
 0x131   : > { %v2755_v42 = vadd.f32 %v2754_v22, %v2753_v44  ;;  %v2756_v48 = vpop.f32.mrb[22].mxu1  ;;  %v2693_v59 = vpop.f32.mrb[23].mxu0 }
 0x132   : > { %v2757_v51 = vpop.f32.mrb[23].mxu1  ;;  %v1689_v20 = vadd.f32 %v2691_v52, %v3922_v27  ;;  %v2694_v61 = vadd.f32 %v2693_v59, %v2692_v54 }
 0x133   : > { %v2758_v55 = vadd.f32 %v2757_v51, %v2756_v48 }
 0x134   : > { %v3955_v1 = vadd.f32 %v2755_v42, %v1689_v20  ;;  %v1692_v29 = vadd.f32 %v2694_v61, %v3922_v27 }
 0x136   : > { %v3958_v4 = vadd.f32 %v2758_v55, %v1692_v29  ;;  %v2695_v7 = vpop.f32.mrb[24].mxu0 }
 0x137   : > { %v2759_v35 = vpop.f32.mrb[24].mxu1  ;;  %v2696_v47 = vpop.f32.mrb[25].mxu0 }
 0x138   : > { %v2760_v19 = vpop.f32.mrb[25].mxu1  ;;  %v2697_v6 = vadd.f32 %v2696_v47, %v2695_v7  ;;  %v2698_v45 = vpop.f32.mrb[26].mxu0 }
 0x139   : > { %v2761_v53 = vadd.f32 %v2760_v19, %v2759_v35  ;;  %v2762_v8 = vpop.f32.mrb[26].mxu1  ;;  %v2699_v62 = vpop.f32.mrb[27].mxu0 }
 0x13a   : > { %v2763_v17 = vpop.f32.mrb[27].mxu1  ;;  %v1697_v9 = vadd.f32 %v2697_v6, %v3922_v27  ;;  %v2700_v26 = vadd.f32 %v2699_v62, %v2698_v45 }
 0x13b   : > { %v2764_v10 = vadd.f32 %v2763_v17, %v2762_v8 }
 0x13c   : > { %v3961_v57 = vadd.f32 %v2761_v53, %v1697_v9  ;;  %v1700_v12 = vadd.f32 %v2700_v26, %v3922_v27 }
 0x13e   : > { %v3964_v49 = vadd.f32 %v2764_v10, %v1700_v12  ;;  %v2701_v15 = vpop.f32.mrb[28].mxu0 }
 0x13f   : > { %v2765_v34 = vpop.f32.mrb[28].mxu1  ;;  %v2702_v16 = vpop.f32.mrb[29].mxu0 }
 0x140   : > { %v2766_v14 = vpop.f32.mrb[29].mxu1  ;;  %v2703_v0 = vadd.f32 %v2702_v16, %v2701_v15  ;;  %v2704_v21 = vpop.f32.mrb[30].mxu0 }
 0x141   : > { %v2767_v40 = vadd.f32 %v2766_v14, %v2765_v34  ;;  %v2768_v41 = vpop.f32.mrb[30].mxu1  ;;  %v2705_v11 = vpop.f32.mrb[31].mxu0 }
 0x142   : > { %v2769_v43 = vpop.f32.mrb[31].mxu1  ;;  %v1705_v2 = vadd.f32 %v2703_v0, %v3922_v27  ;;  %v2706_v28 = vadd.f32 %v2705_v11, %v2704_v21 }
 0x143   : > { %v2770_v24 = vadd.f32 %v2769_v43, %v2768_v41 }
 0x144   : > { %v3967_v30 = vadd.f32 %v2767_v40, %v1705_v2  ;;  %v1708_v37 = vadd.f32 %v2706_v28, %v3922_v27 }
 0x146   : > { %v3970_v36 = vadd.f32 %v2770_v24, %v1708_v37  ;;  %v2787_v39 = vpop.f32.mrb[32].mxu0 }
 0x147   : > { %v2851_v31 = vpop.f32.mrb[32].mxu1  ;;  %v2788_v44 = vpop.f32.mrb[33].mxu0 }
 0x148   : > { %v2852_v32 = vpop.f32.mrb[33].mxu1  ;;  %v2789_v25 = vadd.f32 %v2788_v44, %v2787_v39  ;;  %v2790_v42 = vpop.f32.mrb[34].mxu0 }
 0x149   : > { %v2853_v33 = vadd.f32 %v2852_v32, %v2851_v31  ;;  %v2854_v38 = vpop.f32.mrb[34].mxu1  ;;  %v2791_v50 = vpop.f32.mrb[35].mxu0 }
 0x14a   : > { %v2855_v22 = vpop.f32.mrb[35].mxu1  ;;  %v1843_v51 = vadd.f32 %v2789_v25, %v3925_v13  ;;  %v2792_v52 = vadd.f32 %v2791_v50, %v2790_v42 }
 0x14b   : > { %v2856_v48 = vadd.f32 %v2855_v22, %v2854_v38 }
 0x14c   : > { %v1846_v54 = vadd.f32 %v2792_v52, %v3928_v3  ;;  %v3974_v27 = vadd.f32 %v2853_v33, %v1843_v51 }
 0x14e   : > { %v2793_v20 = vpop.f32.mrb[36].mxu0  ;;  %v3976_v35 = vadd.f32 %v2856_v48, %v1846_v54 }
 0x14f   : > { %v2857_v55 = vpop.f32.mrb[36].mxu1  ;;  %v2794_v19 = vpop.f32.mrb[37].mxu0 }
 0x150   : > { %v2858_v59 = vpop.f32.mrb[37].mxu1  ;;  %v2795_v53 = vadd.f32 %v2794_v19, %v2793_v20  ;;  %v2796_v8 = vpop.f32.mrb[38].mxu0 }
 0x151   : > { %v2859_v61 = vadd.f32 %v2858_v59, %v2857_v55  ;;  %v2860_v29 = vpop.f32.mrb[38].mxu1  ;;  %v2797_v17 = vpop.f32.mrb[39].mxu0 }
 0x152   : > { %v2861_v7 = vpop.f32.mrb[39].mxu1  ;;  %v1851_v13 = vadd.f32 %v2795_v53, %v3931_v56  ;;  %v2798_v6 = vadd.f32 %v2797_v17, %v2796_v8 }
 0x153   : > { %v2862_v47 = vadd.f32 %v2861_v7, %v2860_v29 }
 0x154   : > { %v1854_v3 = vadd.f32 %v2798_v6, %v3934_v63  ;;  %v3980_v10 = vadd.f32 %v2859_v61, %v1851_v13 }
 0x156   : > { %v2799_v9 = vpop.f32.mrb[40].mxu0  ;;  %v3982_v34 = vadd.f32 %v2862_v47, %v1854_v3 }
 0x157   : > { %v2863_v45 = vpop.f32.mrb[40].mxu1  ;;  %v2800_v14 = vpop.f32.mrb[41].mxu0 }
 0x158   : > { %v2864_v62 = vpop.f32.mrb[41].mxu1  ;;  %v2801_v40 = vadd.f32 %v2800_v14, %v2799_v9  ;;  %v2802_v41 = vpop.f32.mrb[42].mxu0 }
 0x159   : > { %v2865_v26 = vadd.f32 %v2864_v62, %v2863_v45  ;;  %v2866_v12 = vpop.f32.mrb[42].mxu1  ;;  %v2803_v43 = vpop.f32.mrb[43].mxu0 }
 0x15a   : > { %v2867_v15 = vpop.f32.mrb[43].mxu1  ;;  %v1859_v56 = vadd.f32 %v2801_v40, %v3937_v58  ;;  %v2804_v0 = vadd.f32 %v2803_v43, %v2802_v41 }
 0x15b   : > { %v2868_v16 = vadd.f32 %v2867_v15, %v2866_v12 }
 0x15c   : > { %v1862_v63 = vadd.f32 %v2804_v0, %v3940_v60  ;;  %v3986_v24 = vadd.f32 %v2865_v26, %v1859_v56 }
 0x15e   : > { %v2805_v2 = vpop.f32.mrb[44].mxu0  ;;  %v3988_v31 = vadd.f32 %v2868_v16, %v1862_v63 }
 0x15f   : > { %v2869_v21 = vpop.f32.mrb[44].mxu1  ;;  %v2806_v32 = vpop.f32.mrb[45].mxu0 }
 0x160   : > { %v2870_v11 = vpop.f32.mrb[45].mxu1  ;;  %v2807_v33 = vadd.f32 %v2806_v32, %v2805_v2  ;;  %v2808_v38 = vpop.f32.mrb[46].mxu0 }
 0x161   : > { %v2871_v28 = vadd.f32 %v2870_v11, %v2869_v21  ;;  %v2872_v37 = vpop.f32.mrb[46].mxu1  ;;  %v2809_v22 = vpop.f32.mrb[47].mxu0 }
 0x162   : > { %v2873_v39 = vpop.f32.mrb[47].mxu1  ;;  %v1867_v58 = vadd.f32 %v2807_v33, %v3943_v18  ;;  %v2810_v25 = vadd.f32 %v2809_v22, %v2808_v38 }
 0x163   : > { %v2874_v44 = vadd.f32 %v2873_v39, %v2872_v37 }
 0x164   : > { %v1870_v60 = vadd.f32 %v2810_v25, %v3946_v23  ;;  %v3992_v48 = vadd.f32 %v2871_v28, %v1867_v58 }
 0x166   : > { %v2811_v51 = vpop.f32.mrb[48].mxu0  ;;  %v3994_v55 = vadd.f32 %v2874_v44, %v1870_v60 }
 0x167   : > { %v2875_v42 = vpop.f32.mrb[48].mxu1  ;;  %v2812_v59 = vpop.f32.mrb[49].mxu0 }
 0x168   : > { %v2876_v50 = vpop.f32.mrb[49].mxu1  ;;  %v2813_v61 = vadd.f32 %v2812_v59, %v2811_v51  ;;  %v2814_v29 = vpop.f32.mrb[50].mxu0 }
 0x169   : > { %v2877_v52 = vadd.f32 %v2876_v50, %v2875_v42  ;;  %v2878_v54 = vpop.f32.mrb[50].mxu1  ;;  %v2815_v7 = vpop.f32.mrb[51].mxu0 }
 0x16a   : > { %v2879_v20 = vpop.f32.mrb[51].mxu1  ;;  %v1875_v18 = vadd.f32 %v2813_v61, %v3949_v5  ;;  %v2816_v53 = vadd.f32 %v2815_v7, %v2814_v29 }
 0x16b   : > { %v2880_v19 = vadd.f32 %v2879_v20, %v2878_v54 }
 0x16c   : > { %v1878_v23 = vadd.f32 %v2816_v53, %v3952_v46  ;;  %v1972_v47 = vadd.f32 %v2877_v52, %v1875_v18 }
 0x16e   : > { %v2817_v13 = vpop.f32.mrb[52].mxu0  ;;  %v1975_v45 = vadd.f32 %v2880_v19, %v1878_v23 }
 0x16f   : > { %v2881_v8 = vpop.f32.mrb[52].mxu1  ;;  %v2818_v62 = vpop.f32.mrb[53].mxu0 }
 0x170   : > { %v2882_v17 = vpop.f32.mrb[53].mxu1  ;;  %v2819_v26 = vadd.f32 %v2818_v62, %v2817_v13  ;;  %v2820_v12 = vpop.f32.mrb[54].mxu0 }
 0x171   : > { %v2883_v6 = vadd.f32 %v2882_v17, %v2881_v8  ;;  %v2884_v3 = vpop.f32.mrb[54].mxu1  ;;  %v2821_v15 = vpop.f32.mrb[55].mxu0 }
 0x172   : > { %v2885_v9 = vpop.f32.mrb[55].mxu1  ;;  %v1883_v40 = vadd.f32 %v2819_v26, %v3955_v1  ;;  %v2822_v41 = vadd.f32 %v2821_v15, %v2820_v12 }
 0x173   : > { %v2886_v14 = vadd.f32 %v2885_v9, %v2884_v3 }
 0x174   : > { %v1886_v5 = vadd.f32 %v2822_v41, %v3958_v4  ;;  %v1980_v46 = vadd.f32 %v2883_v6, %v1883_v40 }
 0x176   : > { %v2823_v56 = vpop.f32.mrb[56].mxu0  ;;  %v1983_v21 = vadd.f32 %v2886_v14, %v1886_v5 }
 0x177   : > { %v2887_v16 = vpop.f32.mrb[56].mxu1  ;;  %v2824_v11 = vpop.f32.mrb[57].mxu0 }
 0x178   : > { %v2888_v43 = vpop.f32.mrb[57].mxu1  ;;  %v2825_v28 = vadd.f32 %v2824_v11, %v2823_v56  ;;  %v2826_v37 = vpop.f32.mrb[58].mxu0 }
 0x179   : > { %v2889_v0 = vadd.f32 %v2888_v43, %v2887_v16  ;;  %v2890_v63 = vpop.f32.mrb[58].mxu1  ;;  %v2827_v39 = vpop.f32.mrb[59].mxu0 }
 0x17a   : > { %v2891_v2 = vpop.f32.mrb[59].mxu1  ;;  %v1891_v33 = vadd.f32 %v2825_v28, %v3961_v57  ;;  %v2828_v38 = vadd.f32 %v2827_v39, %v2826_v37 }
 0x17b   : > { %v2892_v32 = vadd.f32 %v2891_v2, %v2890_v63 }
 0x17c   : > { %v1894_v1 = vadd.f32 %v2828_v38, %v3964_v49  ;;  %v1988_v4 = vadd.f32 %v2889_v0, %v1891_v33 }
 0x17e   : > { %v2829_v58 = vpop.f32.mrb[60].mxu0  ;;  %v1991_v42 = vadd.f32 %v2892_v32, %v1894_v1 }
 0x17f   : > { %v2893_v44 = vpop.f32.mrb[60].mxu1  ;;  %v2830_v50 = vpop.f32.mrb[61].mxu0 }
 0x180   : > { %v2894_v22 = vpop.f32.mrb[61].mxu1  ;;  %v2831_v52 = vadd.f32 %v2830_v50, %v2829_v58  ;;  %v2832_v54 = vpop.f32.mrb[62].mxu0 }
 0x181   : > { %v2895_v25 = vadd.f32 %v2894_v22, %v2893_v44  ;;  %v2896_v60 = vpop.f32.mrb[62].mxu1  ;;  %v2833_v20 = vpop.f32.mrb[63].mxu0 }
 0x182   : > { %v2897_v51 = vpop.f32.mrb[63].mxu1  ;;  %v1899_v57 = vadd.f32 %v2831_v52, %v3967_v30  ;;  %v2834_v61 = vadd.f32 %v2833_v20, %v2832_v54 }
 0x183   : > { %v2898_v59 = vadd.f32 %v2897_v51, %v2896_v60 }
 0x184   : > { %v1902_v49 = vadd.f32 %v2834_v61, %v3970_v36  ;;  %v1996_v19 = vadd.f32 %v2895_v25, %v1899_v57 }
 0x186   : > { %v2933_v53 = vpop.f32.mrb[64].mxu0  ;;  %v1999_v17 = vadd.f32 %v2898_v59, %v1902_v49 }
 0x187   : > { %v2941_v29 = vpop.f32.mrb[64].mxu1  ;;  %v2045_v13 = vadd.f32 %v2933_v53, %v3980_v10  ;;  %v2036_v6 = vpop.f32.mrb[65].mxu0 }
 0x188   : > { %v2077_v7 = vadd.f32 %v2941_v29, %v1980_v46  ;;  %v2068_v18 = vpop.f32.mrb[65].mxu1  ;;  %v2037_v30 = vadd.f32 %v2036_v6, %v3974_v27  ;;  %v2934_v9 = vpop.f32.mrb[66].mxu0 }
 0x189   : > { %v2069_v23 = vadd.f32 %v2068_v18, %v1972_v47  ;;  %v2942_v8 = vpop.f32.mrb[66].mxu1  ;;  %v2048_v12 = vadd.f32 %v2934_v9, %v3982_v34  ;;  %v2039_v47 = vpop.f32.mrb[67].mxu0  ;;  %v2101_v41 = vmax.f32 %v2045_v13, 0.0 }
 0x18a   : > { %v2080_v3 = vadd.f32 %v2942_v8, %v1983_v21  ;;  %v2071_v62 = vpop.f32.mrb[67].mxu1  ;;  %v2109_v26 = vmax.f32 %v2077_v7, 0.0  ;;  %v2040_v40 = vadd.f32 %v2039_v47, %v3976_v35  ;;  %v2099_v46 = vmax.f32 %v2037_v30, 0.0 }
 0x18b   : > { %v2072_v36 = vadd.f32 %v2071_v62, %v1975_v45  ;;  %v2107_v15 = vmax.f32 %v2069_v23, 0.0  ;;  %v2102_v5 = vmax.f32 %v2048_v12, 0.0 }
 0x18c   : > { %v2110_v14 = vmax.f32 %v2080_v3, 0.0  ;;  %v2100_v43 = vmax.f32 %v2040_v40, 0.0 }
 0x18d   : > { %v2108_v10 = vmax.f32 %v2072_v36, 0.0  ;;  %v2604_v45 = vpack.c.bf16 %v2102_v5, %v2101_v41 }
 0x18e   : > { %v2624_v16 = vpack.c.bf16 %v2110_v14, %v2109_v26  ;;  %v2599_v0 = vpack.c.bf16 %v2100_v43, %v2099_v46  ;;  %v2937_v63 = vpop.f32.mrb[68].mxu0 }
 0x18f   : > { %v2619_v56 = vpack.c.bf16 %v2108_v10, %v2107_v15  ;;  %v2945_v27 = vpop.f32.mrb[68].mxu1  ;;  %2636 = vst [vmem:[%s4013_s21 + $0x8] sm:$0xff] %v2604_v45   ;;  %v2061_v2 = vadd.f32 %v2937_v63, %v3992_v48  ;;  %v2052_v28 = vpop.f32.mrb[69].mxu0 }
 0x190   : > { %2640 = vst [vmem:[%s4013_s21 + $0x28] sm:$0xff] %v2624_v16   ;;  %v2093_v34 = vadd.f32 %v2945_v27, %v1996_v19  ;;  %v2084_v35 = vpop.f32.mrb[69].mxu1  ;;  %2600 = vst [vmem:[%s4013_s21] sm:$0xff] %v2599_v0   ;;  %v2053_v39 = vadd.f32 %v2052_v28, %v3986_v24  ;;  %v2938_v33 = vpop.f32.mrb[70].mxu0 }
 0x191   : > { %2639 = vst [vmem:[%s4013_s21 + $0x20] sm:$0xff] %v2619_v56   ;;  %v2085_v21 = vadd.f32 %v2084_v35, %v1988_v4  ;;  %v2946_v11 = vpop.f32.mrb[70].mxu1  ;;  %v2064_v44 = vadd.f32 %v2938_v33, %v3994_v55  ;;  %v2055_v4 = vpop.f32.mrb[71].mxu0  ;;  %v2105_v60 = vmax.f32 %v2061_v2, 0.0 }
 0x192   : > { %v2096_v37 = vadd.f32 %v2946_v11, %v1999_v17  ;;  %v2087_v32 = vpop.f32.mrb[71].mxu1  ;;  %v2113_v1 = vmax.f32 %v2093_v34, 0.0  ;;  %v2056_v48 = vadd.f32 %v2055_v4, %v3988_v31  ;;  %v2103_v50 = vmax.f32 %v2053_v39, 0.0 }
 0x193   : > { %v2088_v38 = vadd.f32 %v2087_v32, %v1991_v42  ;;  %v2111_v58 = vmax.f32 %v2085_v21, 0.0  ;;  %v2106_v24 = vmax.f32 %v2064_v44, 0.0 }
 0x194   : > { %v2114_v22 = vmax.f32 %v2096_v37, 0.0  ;;  %v2104_v51 = vmax.f32 %v2056_v48, 0.0 }
 0x195   : > { %v2112_v25 = vmax.f32 %v2088_v38, 0.0  ;;  %v2614_v55 = vpack.c.bf16 %v2106_v24, %v2105_v60 }
 0x196   : > { %v2634_v42 = vpack.c.bf16 %v2114_v22, %v2113_v1  ;;  %v2609_v31 = vpack.c.bf16 %v2104_v51, %v2103_v50 }
 0x197   : > { %v2629_v52 = vpack.c.bf16 %v2112_v25, %v2111_v58  ;;  %2638 = vst [vmem:[%s4013_s21 + $0x18] sm:$0xff] %v2614_v55  }
 0x198   : > { %2642 = vst [vmem:[%s4013_s21 + $0x38] sm:$0xff] %v2634_v42   ;;  %2637 = vst [vmem:[%s4013_s21 + $0x10] sm:$0xff] %v2609_v31  }
 0x199   : > { %2641 = vst [vmem:[%s4013_s21 + $0x30] sm:$0xff] %v2629_v52  }
 0x19a   : > { %3194 = shalt.err (!%p3191_p6)
}
 0x19b   : > { %s3195_s8 = scalar_lea.hbm %s4028_s5, 1024  ;;  %s3199_s20 = scalar_lea.hbm %s4092_s3, 4096 }
 0x19c   : > { %p3196_p7 = scmp.ne.s32.totalorder %s4028_s5, %s3195_s8  ;;  %p3200_p11 = scmp.lt.u32.totalorder %s4028_s5, %s4092_s3 }
 0x19d   : > { %p3201_p12 = scmp.lt.u32.totalorder %s3199_s20, %s3195_s8  ;;  %p3203_p0 = scmp.lt.u32.totalorder %s3195_s8, %s4028_s5 }
 0x19e   : > { %p3197_p9 = pnand %p3196_p7, %p3351_p3 }
 0x19f   : > { %p3202_p13 = por %p3201_p12, %p3200_p11 }
 0x1a0   : > { %p3198_p10 = pneg %p3197_p9 }
 0x1a1   : > { %p3204_p1 = por %p3203_p0, %p3202_p13 }
 0x1a3   : > { %p3205_p2 = pnand %p3204_p1, %p3198_p10 }
 0x1a5   : > { %3208 = shalt.err (!%p3205_p2)
}
 0x1a6   : > { %s3278_s16 = smov 64   ;;  %s3279_s9 = smov 4  }
 0x1a7   : > { %2964 = dma.vmem_to_hbm [thread:$0]  (%p3351_p3), %s4030_s27, 1024, %s4028_s5, %s4037_s24, %s3278_s16, %s3278_s16, %s3279_s9  }
 0x1a8 PF: > { %p2970_p4 = scmp.ge.s32.totalorder %s3275_s19, 2  ;;  %s2228_s4 = sand.u32 1, %s3247_s12  }
 0x1a9   : > { %s2229_s29 = scalar_lea.sflag [#allocation3], %s2228_s4 }
 0x1aa   : > { %p2967_p5 = pnand %p2970_p4, %p3360_p8 }
 0x1ac   : > { %3242 = dma.done.wait (!%p2967_p5), %s2229_s29, 1024  }
 0x1ad   : > { %3244 = vsyncadd (!%p2967_p5), %s2229_s29, 4294966272  ;;  %s16_s19 = sadd.s32 1, %s3275_s19   ;;  %s4095_s12 = smov %s3251_s13 }
 0x1ae   : > { %p13_p6 = scmp.ge.s32.totalorder %s16_s19, 6   ;;  %s4096_s13 = smov %s3255_s14 }
 0x1af   : > { %s4097_s14 = smov %s3369_s30  ;;  %s4098_s15 = smov %s3267_s17 }
 0x1b0   : > { %s4099_s16 = smov %s3271_s18  ;;  %s4100_s17 = smov %s4103_s22 }
 0x1b1   : > { %s4101_s18 = smov %s4107_s23  ;;  %15 = sbr.rel (!%p13_p6) target bundleno = 5 (0x5), region = 76 }
 0x1b8   :  { %2234 = vsyncpa [#allocation3], 1 }
 0x1b9   :  { %2236 = vsyncpa [#allocation3 + $0x1], 1 }

</bundles_post_ra>
